<compile_context>
chip_gen: v7x
topology: tpu7x:2x2x1
jax: 0.10.0
libtpu: 0.0.40
codegen_flags: <defaults>
</compile_context>

<pallas_src>
import functools

import jax
import jax.numpy as jnp
from jax import lax
from jax.experimental import pallas as pl
from jax.experimental.pallas import tpu as pltpu

KH = KW = 5     # kernel size
PAD = 2         # spatial padding
STRIDE = 2      # spatial stride (hard-coded to 2 in the PyTorch module)


def _conv5x5_s2_kernel(x_ref, w_ref, b_ref, o_ref, xpad_ref, patches_ref):
    """Grid = (batch "parallel", out-channel blocks "arbitrary", innermost).

    x_ref       : (2, Hh, 2, Wh, Cin)     phase-split input (read only at co==0)
    w_ref       : (BCO, 25*Cin)           weight taps, (dy, dx, ci)-major along K
    b_ref       : (BCO, 1)                bias
    o_ref       : (BCO, Ho*Wo)            channel-major lane-dense output block
    xpad_ref    : (2, Hh+2, 2, Wh+2, Cin) persistent padded phase-split scratch
    patches_ref : (Ho*Wo, 25*Cin)         persistent im2col scratch (matmul dtype)
    """
    co = pl.program_id(1)
    _, hp, _, wp, cin = xpad_ref.shape
    hh, wh = hp - 2, wp - 2
    ho, wo = hh, wh

    # Padding + im2col hoisted out of the out-channel loop: built once per
    # batch element and reused for every co block.
    @pl.when(co == 0)
    def _build_patches():
        # Zero only the four 1-wide halo strips; the interior is overwritten.
        zrow = jnp.zeros((2, 1, 2, wp, cin), dtype=xpad_ref.dtype)
        xpad_ref[:, 0:1, :, :, :] = zrow
        xpad_ref[:, hh + 1:hh + 2, :, :, :] = zrow
        zcol = jnp.zeros((2, hp, 2, 1, cin), dtype=xpad_ref.dtype)
        xpad_ref[:, :, :, 0:1, :] = zcol
        xpad_ref[:, :, :, wh + 1:wh + 2, :] = zcol
        # Copy input into the interior (pad=2 original == pad=1 per phase).
        xpad_ref[:, 1:1 + hh, :, 1:1 + wh, :] = x_ref[...]

        # im2col: 25 taps, all static stride-free slices, because
        #   xpad[2i+dy, 2j+dx, c] == xp[dy%2, i+dy//2, dx%2, j+dx//2, c].
        xp = xpad_ref[...]
        taps = []
        for dy in range(KH):
            py, qy = dy % 2, dy // 2
            for dx in range(KW):
                px, qx = dx % 2, dx // 2
                taps.append(xp[py, qy:qy + ho, px, qx:qx + wo, :])
        patches = jnp.concatenate(taps, axis=-1)              # (Ho, Wo, 25*Cin)
        # Flatten to a clean 2-D matmul operand; cast (e.g. to bf16) only at
        # the MXU boundary so the im2col arithmetic stays in the input dtype.
        patches_ref[...] = patches.reshape(ho * wo, KH * KW * cin).astype(
            patches_ref.dtype)

    # Single fused MXU contraction with K = 25*Cin; weights as LHS so the
    # result is channel-major (BCO, Ho*Wo): lane-dense stores, and no
    # NHWC->NCHW transpose in the wrapper.
    acc = lax.dot_general(
        w_ref[...], patches_ref[...],
        dimension_numbers=(((1,), (1,)), ((), ())),
        preferred_element_type=jnp.float32,
    )                                                         # (BCO, Ho*Wo)
    o_ref[...] = (acc + b_ref[...]).astype(o_ref.dtype)


def conv2d_pallas(x_nchw, weight_oihw, bias, *, matmul_dtype=None):
    """PyTorch-equivalent forward: 5x5 conv, stride 2, padding 2, bias.

    x_nchw: (N, C_in, H, W); weight_oihw: (C_out, C_in, 5, 5); bias: (C_out,).
    matmul_dtype: dtype for the MXU operands (e.g. jnp.bfloat16 on v6e/v7x);
                  defaults to the input dtype.
    Returns (N, C_out, H//2, W//2).
    """
    n, cin, h, w = x_nchw.shape
    cout = weight_oihw.shape[0]
    assert weight_oihw.shape == (cout, cin, KH, KW)
    assert h % 2 == 0 and w % 2 == 0, "kernel assumes even spatial dims"
    hh, wh = h // 2, w // 2          # per-phase (half) spatial extents
    ho, wo = hh, wh                  # output extents for k=5, p=2, s=2
    if matmul_dtype is None:
        matmul_dtype = x_nchw.dtype

    # Layout plumbing (single XLA pass): NCHW -> NHWC -> 2x2 spatial phase
    # split, making every stride-2 tap a plain contiguous slice in-kernel.
    # TODO(synk): fuse this repack into the upstream producer to avoid the
    # extra HBM round-trip of the input (matters most on v5e's low HBM BW).
    x_nhwc = jnp.transpose(x_nchw, (0, 2, 3, 1))
    x_ph = x_nhwc.reshape(n, hh, 2, wh, 2, cin).transpose(0, 2, 1, 4, 3, 5)

    # Weights -> one (Cout, 25*Cin) matrix (taps ordered dy, dx, ci), cast once
    # to the matmul dtype. Bias -> (Cout, 1) so it broadcasts over Ho*Wo lanes.
    w_mat = jnp.transpose(weight_oihw, (0, 2, 3, 1)).reshape(cout, KH * KW * cin)
    w_mat = w_mat.astype(matmul_dtype)
    b2d = bias.reshape(cout, 1).astype(jnp.float32)

    # Out-channel blocking; pad ragged cout up to a multiple of the block.
    bco = min(cout, 128)
    cout_p = ((cout + bco - 1) // bco) * bco
    if cout_p != cout:
        w_mat = jnp.pad(w_mat, ((0, cout_p - cout), (0, 0)))
        b2d = jnp.pad(b2d, ((0, cout_p - cout), (0, 0)))

    # VMEM budget: ~75% of physical (≈96 MiB on v5e/v6e, ≈48 MiB on v7x).
    try:
        vmem_cap = int(pltpu.get_tpu_info().vmem_capacity_bytes)
    except Exception:
        vmem_cap = 64 * 1024 * 1024
    vmem_limit = min(vmem_cap * 3 // 4, 100 * 1024 * 1024)

    # Grid: batch outer ("parallel" -> megacore-shardable on v7x), out-channel
    # blocks inner ("arbitrary" so the co==0 im2col guard is valid per core and
    # the larger image block stays VMEM-resident across co steps; for tiny
    # spatial / huge channel layers the order would be swapped).
    # TODO(synk): for large H*W*Cin (esp. v7x's 64 MiB VMEM) add an output-row
    # tile axis with manual halo DMA (memory_space=pl.ANY) to bound the
    # persistent patches scratch; unnecessary at these shapes.
    grid = (n, cout_p // bco)

    out_flat = pl.pallas_call(
        _conv5x5_s2_kernel,
        out_shape=jax.ShapeDtypeStruct((n, cout_p, ho * wo), x_nchw.dtype),
        grid=grid,
        in_specs=[
            pl.BlockSpec((None, 2, hh, 2, wh, cin),
                         lambda b, co: (b, 0, 0, 0, 0, 0)),
            pl.BlockSpec((bco, KH * KW * cin), lambda b, co: (co, 0)),
            pl.BlockSpec((bco, 1), lambda b, co: (co, 0)),
        ],
        out_specs=pl.BlockSpec((None, bco, ho * wo), lambda b, co: (b, co, 0)),
        scratch_shapes=[
            pltpu.VMEM((2, hh + 2, 2, wh + 2, cin), x_nchw.dtype),
            pltpu.VMEM((ho * wo, KH * KW * cin), matmul_dtype),
        ],
        compiler_params=pltpu.CompilerParams(
            dimension_semantics=("parallel", "arbitrary"),
            vmem_limit_bytes=vmem_limit,
        ),
    )(x_ph, w_mat, b2d)

    # Output is already channel-major: a free reshape gives NCHW (no transpose).
    return out_flat.reshape(n, cout_p, ho, wo)[:, :cout]


if __name__ == "__main__":
    key = jax.random.PRNGKey(0)
    n, cin, h, w = 2, 4, 16, 16
    cout = 4

    kx, kw_ = jax.random.split(key)
    x = jax.random.normal(kx, (n, cin, h, w), dtype=jnp.float32)
    # Match the PyTorch init: weight ~ N(0, 0.02), bias zeros.
    weight = 0.02 * jax.random.normal(kw_, (cout, cin, KH, KW), dtype=jnp.float32)
    bias = jnp.zeros((cout,), jnp.float32)

    # Pure-XLA reference for correctness checks.
    ref = lax.conv_general_dilated(
        x, weight, window_strides=(STRIDE, STRIDE),
        padding=((PAD, PAD), (PAD, PAD)),
        dimension_numbers=("NCHW", "OIHW", "NCHW"),
    ) + bias.reshape(1, cout, 1, 1)

    # Full-precision path.
    out = jax.block_until_ready(jax.jit(conv2d_pallas)(x, weight, bias))
    assert out.shape == (n, cout, h // 2, w // 2), out.shape
    assert jnp.allclose(out, ref, atol=1e-4, rtol=1e-4), "f32 mismatch vs reference"

    # bf16 MXU-operand path (v6e/v7x fast path); looser tolerance.
    conv_bf16 = jax.jit(functools.partial(conv2d_pallas, matmul_dtype=jnp.bfloat16))
    out_bf16 = jax.block_until_ready(conv_bf16(x, weight, bias))
    assert jnp.allclose(out_bf16, ref, atol=2e-2, rtol=5e-2), "bf16 mismatch vs reference"

    print("KERNEL_OK")
</pallas_src>

<mosaic_0001>
module attributes {stable_mosaic.version = 11 : i64} {
  func.func @_conv5x5_s2_kernel(%arg0: i32, %arg1: i32, %arg2: memref<1x2x8x2x8x4xf32, #tpu.memory_space<vmem>>, %arg3: memref<4x100xf32, #tpu.memory_space<vmem>>, %arg4: memref<4x1xf32, #tpu.memory_space<vmem>>, %arg5: memref<1x4x64xf32, #tpu.memory_space<vmem>>, %arg6: memref<2x10x2x10x4xf32, #tpu.memory_space<vmem>>, %arg7: memref<64x100xf32, #tpu.memory_space<vmem>>) attributes {dimension_semantics = [#tpu.dimension_semantics<parallel>, #tpu.dimension_semantics<arbitrary>], iteration_bounds = array<i64: 2, 1>, scalar_prefetch = 0 : i64, scratch_operands = 2 : i64, tpu.core_type = #tpu.core_type<tc>, window_params = [{transform_indices = @transform_0, window_bounds = array<i64: 1, 2, 8, 2, 8, 4>}, {transform_indices = @transform_1, window_bounds = array<i64: 4, 100>}, {transform_indices = @transform_2, window_bounds = array<i64: 4, 1>}, {transform_indices = @transform_3, window_bounds = array<i64: 1, 4, 64>}]} {
    %c0_i32 = arith.constant 0 : i32
    %0 = arith.cmpi eq, %arg1, %c0_i32 : i32
    %1 = arith.extui %0 : i1 to i32
    %c0_i32_0 = arith.constant 0 : i32
    %2 = arith.cmpi ne, %1, %c0_i32_0 : i32
    scf.if %2 {
      %cst_9 = arith.constant 0.000000e+00 : f32
      %12 = vector.broadcast %cst_9 : f32 to vector<2x1x2x10x4xf32>
      %c0_10 = arith.constant 0 : index
      %c0_11 = arith.constant 0 : index
      %c0_12 = arith.constant 0 : index
      %c0_13 = arith.constant 0 : index
      %c0_14 = arith.constant 0 : index
      %13 = vector.load %arg6[%c0_10, %c0_11, %c0_12, %c0_13, %c0_14] : memref<2x10x2x10x4xf32, #tpu.memory_space<vmem>>, vector<2x1x2x10x4xf32>
      tpu.vector_store %arg6[%c0_10, %c0_11, %c0_12, %c0_13, %c0_14], %12 {strides = array<i32>} : memref<2x10x2x10x4xf32, #tpu.memory_space<vmem>>, vector<2x1x2x10x4xf32>,
      %c0_15 = arith.constant 0 : index
      %c9 = arith.constant 9 : index
      %c0_16 = arith.constant 0 : index
      %c0_17 = arith.constant 0 : index
      %c0_18 = arith.constant 0 : index
      %14 = vector.load %arg6[%c0_15, %c9, %c0_16, %c0_17, %c0_18] : memref<2x10x2x10x4xf32, #tpu.memory_space<vmem>>, vector<2x1x2x10x4xf32>
      tpu.vector_store %arg6[%c0_15, %c9, %c0_16, %c0_17, %c0_18], %12 {strides = array<i32>} : memref<2x10x2x10x4xf32, #tpu.memory_space<vmem>>, vector<2x1x2x10x4xf32>,
      %cst_19 = arith.constant 0.000000e+00 : f32
      %15 = vector.broadcast %cst_19 : f32 to vector<2x10x2x1x4xf32>
      %c0_20 = arith.constant 0 : index
      %c0_21 = arith.constant 0 : index
      %c0_22 = arith.constant 0 : index
      %c0_23 = arith.constant 0 : index
      %c0_24 = arith.constant 0 : index
      %16 = vector.load %arg6[%c0_20, %c0_21, %c0_22, %c0_23, %c0_24] : memref<2x10x2x10x4xf32, #tpu.memory_space<vmem>>, vector<2x10x2x1x4xf32>
      tpu.vector_store %arg6[%c0_20, %c0_21, %c0_22, %c0_23, %c0_24], %15 {strides = array<i32>} : memref<2x10x2x10x4xf32, #tpu.memory_space<vmem>>, vector<2x10x2x1x4xf32>,
      %c0_25 = arith.constant 0 : index
      %c0_26 = arith.constant 0 : index
      %c0_27 = arith.constant 0 : index
      %c9_28 = arith.constant 9 : index
      %c0_29 = arith.constant 0 : index
      %17 = vector.load %arg6[%c0_25, %c0_26, %c0_27, %c9_28, %c0_29] : memref<2x10x2x10x4xf32, #tpu.memory_space<vmem>>, vector<2x10x2x1x4xf32>
      tpu.vector_store %arg6[%c0_25, %c0_26, %c0_27, %c9_28, %c0_29], %15 {strides = array<i32>} : memref<2x10x2x10x4xf32, #tpu.memory_space<vmem>>, vector<2x10x2x1x4xf32>,
      %c0_30 = arith.constant 0 : index
      %c0_31 = arith.constant 0 : index
      %c0_32 = arith.constant 0 : index
      %c0_33 = arith.constant 0 : index
      %c0_34 = arith.constant 0 : index
      %c0_35 = arith.constant 0 : index
      %18 = vector.load %arg2[%c0_30, %c0_31, %c0_32, %c0_33, %c0_34, %c0_35] : memref<1x2x8x2x8x4xf32, #tpu.memory_space<vmem>>, vector<1x2x8x2x8x4xf32>
      %19 = vector.shape_cast %18 : vector<1x2x8x2x8x4xf32> to vector<2x8x2x8x4xf32>
      %c0_36 = arith.constant 0 : index
      %c1 = arith.constant 1 : index
      %c0_37 = arith.constant 0 : index
      %c1_38 = arith.constant 1 : index
      %c0_39 = arith.constant 0 : index
      %20 = vector.load %arg6[%c0_36, %c1, %c0_37, %c1_38, %c0_39] : memref<2x10x2x10x4xf32, #tpu.memory_space<vmem>>, vector<2x8x2x8x4xf32>
      tpu.vector_store %arg6[%c0_36, %c1, %c0_37, %c1_38, %c0_39], %19 {strides = array<i32>} : memref<2x10x2x10x4xf32, #tpu.memory_space<vmem>>, vector<2x8x2x8x4xf32>,
      %c0_40 = arith.constant 0 : index
      %c0_41 = arith.constant 0 : index
      %c0_42 = arith.constant 0 : index
      %c0_43 = arith.constant 0 : index
      %c0_44 = arith.constant 0 : index
      %21 = vector.load %arg6[%c0_40, %c0_41, %c0_42, %c0_43, %c0_44] : memref<2x10x2x10x4xf32, #tpu.memory_space<vmem>>, vector<2x10x2x10x4xf32>
      %22 = vector.extract_strided_slice %21 {offsets = [0, 0, 0, 0, 0], sizes = [1, 8, 1, 8, 4], strides = [1, 1, 1, 1, 1]} : vector<2x10x2x10x4xf32> to vector<1x8x1x8x4xf32>
      %23 = vector.shape_cast %22 : vector<1x8x1x8x4xf32> to vector<8x8x4xf32>
      %24 = vector.extract_strided_slice %21 {offsets = [0, 0, 1, 0, 0], sizes = [1, 8, 1, 8, 4], strides = [1, 1, 1, 1, 1]} : vector<2x10x2x10x4xf32> to vector<1x8x1x8x4xf32>
      %25 = vector.shape_cast %24 : vector<1x8x1x8x4xf32> to vector<8x8x4xf32>
      %26 = vector.extract_strided_slice %21 {offsets = [0, 0, 0, 1, 0], sizes = [1, 8, 1, 8, 4], strides = [1, 1, 1, 1, 1]} : vector<2x10x2x10x4xf32> to vector<1x8x1x8x4xf32>
      %27 = vector.shape_cast %26 : vector<1x8x1x8x4xf32> to vector<8x8x4xf32>
      %28 = vector.extract_strided_slice %21 {offsets = [0, 0, 1, 1, 0], sizes = [1, 8, 1, 8, 4], strides = [1, 1, 1, 1, 1]} : vector<2x10x2x10x4xf32> to vector<1x8x1x8x4xf32>
      %29 = vector.shape_cast %28 : vector<1x8x1x8x4xf32> to vector<8x8x4xf32>
      %30 = vector.extract_strided_slice %21 {offsets = [0, 0, 0, 2, 0], sizes = [1, 8, 1, 8, 4], strides = [1, 1, 1, 1, 1]} : vector<2x10x2x10x4xf32> to vector<1x8x1x8x4xf32>
      %31 = vector.shape_cast %30 : vector<1x8x1x8x4xf32> to vector<8x8x4xf32>
      %32 = vector.extract_strided_slice %21 {offsets = [1, 0, 0, 0, 0], sizes = [1, 8, 1, 8, 4], strides = [1, 1, 1, 1, 1]} : vector<2x10x2x10x4xf32> to vector<1x8x1x8x4xf32>
      %33 = vector.shape_cast %32 : vector<1x8x1x8x4xf32> to vector<8x8x4xf32>
      %34 = vector.extract_strided_slice %21 {offsets = [1, 0, 1, 0, 0], sizes = [1, 8, 1, 8, 4], strides = [1, 1, 1, 1, 1]} : vector<2x10x2x10x4xf32> to vector<1x8x1x8x4xf32>
      %35 = vector.shape_cast %34 : vector<1x8x1x8x4xf32> to vector<8x8x4xf32>
      %36 = vector.extract_strided_slice %21 {offsets = [1, 0, 0, 1, 0], sizes = [1, 8, 1, 8, 4], strides = [1, 1, 1, 1, 1]} : vector<2x10x2x10x4xf32> to vector<1x8x1x8x4xf32>
      %37 = vector.shape_cast %36 : vector<1x8x1x8x4xf32> to vector<8x8x4xf32>
      %38 = vector.extract_strided_slice %21 {offsets = [1, 0, 1, 1, 0], sizes = [1, 8, 1, 8, 4], strides = [1, 1, 1, 1, 1]} : vector<2x10x2x10x4xf32> to vector<1x8x1x8x4xf32>
      %39 = vector.shape_cast %38 : vector<1x8x1x8x4xf32> to vector<8x8x4xf32>
      %40 = vector.extract_strided_slice %21 {offsets = [1, 0, 0, 2, 0], sizes = [1, 8, 1, 8, 4], strides = [1, 1, 1, 1, 1]} : vector<2x10x2x10x4xf32> to vector<1x8x1x8x4xf32>
      %41 = vector.shape_cast %40 : vector<1x8x1x8x4xf32> to vector<8x8x4xf32>
      %42 = vector.extract_strided_slice %21 {offsets = [0, 1, 0, 0, 0], sizes = [1, 8, 1, 8, 4], strides = [1, 1, 1, 1, 1]} : vector<2x10x2x10x4xf32> to vector<1x8x1x8x4xf32>
      %43 = vector.shape_cast %42 : vector<1x8x1x8x4xf32> to vector<8x8x4xf32>
      %44 = vector.extract_strided_slice %21 {offsets = [0, 1, 1, 0, 0], sizes = [1, 8, 1, 8, 4], strides = [1, 1, 1, 1, 1]} : vector<2x10x2x10x4xf32> to vector<1x8x1x8x4xf32>
      %45 = vector.shape_cast %44 : vector<1x8x1x8x4xf32> to vector<8x8x4xf32>
      %46 = vector.extract_strided_slice %21 {offsets = [0, 1, 0, 1, 0], sizes = [1, 8, 1, 8, 4], strides = [1, 1, 1, 1, 1]} : vector<2x10x2x10x4xf32> to vector<1x8x1x8x4xf32>
      %47 = vector.shape_cast %46 : vector<1x8x1x8x4xf32> to vector<8x8x4xf32>
      %48 = vector.extract_strided_slice %21 {offsets = [0, 1, 1, 1, 0], sizes = [1, 8, 1, 8, 4], strides = [1, 1, 1, 1, 1]} : vector<2x10x2x10x4xf32> to vector<1x8x1x8x4xf32>
      %49 = vector.shape_cast %48 : vector<1x8x1x8x4xf32> to vector<8x8x4xf32>
      %50 = vector.extract_strided_slice %21 {offsets = [0, 1, 0, 2, 0], sizes = [1, 8, 1, 8, 4], strides = [1, 1, 1, 1, 1]} : vector<2x10x2x10x4xf32> to vector<1x8x1x8x4xf32>
      %51 = vector.shape_cast %50 : vector<1x8x1x8x4xf32> to vector<8x8x4xf32>
      %52 = vector.extract_strided_slice %21 {offsets = [1, 1, 0, 0, 0], sizes = [1, 8, 1, 8, 4], strides = [1, 1, 1, 1, 1]} : vector<2x10x2x10x4xf32> to vector<1x8x1x8x4xf32>
      %53 = vector.shape_cast %52 : vector<1x8x1x8x4xf32> to vector<8x8x4xf32>
      %54 = vector.extract_strided_slice %21 {offsets = [1, 1, 1, 0, 0], sizes = [1, 8, 1, 8, 4], strides = [1, 1, 1, 1, 1]} : vector<2x10x2x10x4xf32> to vector<1x8x1x8x4xf32>
      %55 = vector.shape_cast %54 : vector<1x8x1x8x4xf32> to vector<8x8x4xf32>
      %56 = vector.extract_strided_slice %21 {offsets = [1, 1, 0, 1, 0], sizes = [1, 8, 1, 8, 4], strides = [1, 1, 1, 1, 1]} : vector<2x10x2x10x4xf32> to vector<1x8x1x8x4xf32>
      %57 = vector.shape_cast %56 : vector<1x8x1x8x4xf32> to vector<8x8x4xf32>
      %58 = vector.extract_strided_slice %21 {offsets = [1, 1, 1, 1, 0], sizes = [1, 8, 1, 8, 4], strides = [1, 1, 1, 1, 1]} : vector<2x10x2x10x4xf32> to vector<1x8x1x8x4xf32>
      %59 = vector.shape_cast %58 : vector<1x8x1x8x4xf32> to vector<8x8x4xf32>
      %60 = vector.extract_strided_slice %21 {offsets = [1, 1, 0, 2, 0], sizes = [1, 8, 1, 8, 4], strides = [1, 1, 1, 1, 1]} : vector<2x10x2x10x4xf32> to vector<1x8x1x8x4xf32>
      %61 = vector.shape_cast %60 : vector<1x8x1x8x4xf32> to vector<8x8x4xf32>
      %62 = vector.extract_strided_slice %21 {offsets = [0, 2, 0, 0, 0], sizes = [1, 8, 1, 8, 4], strides = [1, 1, 1, 1, 1]} : vector<2x10x2x10x4xf32> to vector<1x8x1x8x4xf32>
      %63 = vector.shape_cast %62 : vector<1x8x1x8x4xf32> to vector<8x8x4xf32>
      %64 = vector.extract_strided_slice %21 {offsets = [0, 2, 1, 0, 0], sizes = [1, 8, 1, 8, 4], strides = [1, 1, 1, 1, 1]} : vector<2x10x2x10x4xf32> to vector<1x8x1x8x4xf32>
      %65 = vector.shape_cast %64 : vector<1x8x1x8x4xf32> to vector<8x8x4xf32>
      %66 = vector.extract_strided_slice %21 {offsets = [0, 2, 0, 1, 0], sizes = [1, 8, 1, 8, 4], strides = [1, 1, 1, 1, 1]} : vector<2x10x2x10x4xf32> to vector<1x8x1x8x4xf32>
      %67 = vector.shape_cast %66 : vector<1x8x1x8x4xf32> to vector<8x8x4xf32>
      %68 = vector.extract_strided_slice %21 {offsets = [0, 2, 1, 1, 0], sizes = [1, 8, 1, 8, 4], strides = [1, 1, 1, 1, 1]} : vector<2x10x2x10x4xf32> to vector<1x8x1x8x4xf32>
      %69 = vector.shape_cast %68 : vector<1x8x1x8x4xf32> to vector<8x8x4xf32>
      %70 = vector.extract_strided_slice %21 {offsets = [0, 2, 0, 2, 0], sizes = [1, 8, 1, 8, 4], strides = [1, 1, 1, 1, 1]} : vector<2x10x2x10x4xf32> to vector<1x8x1x8x4xf32>
      %71 = vector.shape_cast %70 : vector<1x8x1x8x4xf32> to vector<8x8x4xf32>
      %72 = tpu.concatenate %23, %25, %27, %29, %31, %33, %35, %37, %39, %41, %43, %45, %47, %49, %51, %53 in 2 : vector<8x8x4xf32>, vector<8x8x4xf32>, vector<8x8x4xf32>, vector<8x8x4xf32>, vector<8x8x4xf32>, vector<8x8x4xf32>, vector<8x8x4xf32>, vector<8x8x4xf32>, vector<8x8x4xf32>, vector<8x8x4xf32>, vector<8x8x4xf32>, vector<8x8x4xf32>, vector<8x8x4xf32>, vector<8x8x4xf32>, vector<8x8x4xf32>, vector<8x8x4xf32> -> vector<8x8x64xf32>
      %73 = tpu.concatenate %55, %57, %59, %61, %63, %65, %67, %69, %71 in 2 : vector<8x8x4xf32>, vector<8x8x4xf32>, vector<8x8x4xf32>, vector<8x8x4xf32>, vector<8x8x4xf32>, vector<8x8x4xf32>, vector<8x8x4xf32>, vector<8x8x4xf32>, vector<8x8x4xf32> -> vector<8x8x36xf32>
      %74 = tpu.concatenate %72, %73 in 2 : vector<8x8x64xf32>, vector<8x8x36xf32> -> vector<8x8x100xf32>
      %75 = vector.shape_cast %74 : vector<8x8x100xf32> to vector<64x100xf32>
      %c0_45 = arith.constant 0 : index
      %c0_46 = arith.constant 0 : index
      %76 = vector.load %arg7[%c0_45, %c0_46] : memref<64x100xf32, #tpu.memory_space<vmem>>, vector<64x100xf32>
      tpu.vector_store %arg7[%c0_45, %c0_46], %75 {strides = array<i32>} : memref<64x100xf32, #tpu.memory_space<vmem>>, vector<64x100xf32>,
    } else {
    }
    %c0 = arith.constant 0 : index
    %c0_1 = arith.constant 0 : index
    %3 = vector.load %arg3[%c0, %c0_1] : memref<4x100xf32, #tpu.memory_space<vmem>>, vector<4x100xf32>
    %c0_2 = arith.constant 0 : index
    %c0_3 = arith.constant 0 : index
    %4 = vector.load %arg7[%c0_2, %c0_3] : memref<64x100xf32, #tpu.memory_space<vmem>>, vector<64x100xf32>
    %cst = arith.constant dense<0.000000e+00> : vector<4x64xf32>
    %5 = tpu.matmul %3, %4, %cst {dimension_numbers = #tpu.dot_dimension_numbers<[1], [1], [0], [0], [0, 0, 1, 0], [], []>} : vector<4x100xf32>, vector<64x100xf32>, vector<4x64xf32> -> vector<4x64xf32>
    %c0_4 = arith.constant 0 : index
    %c0_5 = arith.constant 0 : index
    %6 = vector.load %arg4[%c0_4, %c0_5] : memref<4x1xf32, #tpu.memory_space<vmem>>, vector<4x1xf32>
    %7 = vector.broadcast %6 : vector<4x1xf32> to vector<4x64xf32>
    %8 = arith.addf %5, %7 : vector<4x64xf32>
    %c0_6 = arith.constant 0 : index
    %c0_7 = arith.constant 0 : index
    %c0_8 = arith.constant 0 : index
    %9 = vector.load %arg5[%c0_6, %c0_7, %c0_8] : memref<1x4x64xf32, #tpu.memory_space<vmem>>, vector<1x4x64xf32>
    %10 = vector.shape_cast %9 : vector<1x4x64xf32> to vector<4x64xf32>
    %11 = vector.shape_cast %8 : vector<4x64xf32> to vector<1x4x64xf32>
    tpu.vector_store %arg5[%c0_6, %c0_7, %c0_8], %11 {strides = array<i32>} : memref<1x4x64xf32, #tpu.memory_space<vmem>>, vector<1x4x64xf32>,
    return
  }
  func.func @transform_0(%arg0: i32, %arg1: i32) -> (i32, i32, i32, i32, i32, i32) {
    %c0_i32 = arith.constant 0 : i32
    %c0_i32_0 = arith.constant 0 : i32
    %c0_i32_1 = arith.constant 0 : i32
    %c0_i32_2 = arith.constant 0 : i32
    %c0_i32_3 = arith.constant 0 : i32
    %c0_i32_4 = arith.constant 0 : i32
    return %arg0, %c0_i32, %c0_i32_0, %c0_i32_1, %c0_i32_2, %c0_i32_3 : i32, i32, i32, i32, i32, i32
  }
  func.func @transform_1(%arg0: i32, %arg1: i32) -> (i32, i32) {
    %c0_i32 = arith.constant 0 : i32
    %c0_i32_0 = arith.constant 0 : i32
    return %arg1, %c0_i32 : i32, i32
  }
  func.func @transform_2(%arg0: i32, %arg1: i32) -> (i32, i32) {
    %c0_i32 = arith.constant 0 : i32
    %c0_i32_0 = arith.constant 0 : i32
    return %arg1, %c0_i32 : i32, i32
  }
  func.func @transform_3(%arg0: i32, %arg1: i32) -> (i32, i32, i32) {
    %c0_i32 = arith.constant 0 : i32
    %c0_i32_0 = arith.constant 0 : i32
    return %arg0, %arg1, %c0_i32 : i32, i32, i32
  }
}

</mosaic_0001>

<bundles_post_ra>
// kernel: conv2d_pallas.1
= control target key start
LH: loop header
LB: loop body
LE: loop exit
PB: predicated region body
PF: predicated region fallthrough
CT: control target
= control target key end

     0   :  { %s1915_s12 = smov 0   ;;  %s1917_s13 = smov 0   ;;  %s3377_s0 = inlined_call_operand.vmem [shape: f32[2,2,8,2,8,4], index: 0, kind: input, shape index: {}]   ;;  %s3378_s1 = inlined_call_operand.vmem [shape: f32[4,100], index: 1, kind: input, shape index: {}]   ;;  %s3379_s2 = inlined_call_operand.vmem [shape: f32[4,1], index: 2, kind: input, shape index: {}]   ;;  %s3380_s3 = inlined_call_operand.vmem [shape: f32[2,4,64], index: 3, kind: output, shape index: {}]  }
   0x1   :  { %s1919_s14 = smov 0  }
   0x2 LB: > { %s25_s15 = sadd.s32 1, %s1869_s13  ;;  %p1740_p0 = scmp.ge.s32.totalorder %s1873_s14, 1  ;;  %s1873_s14 = sphi %s1919_s14, %s13_s14   ;;  %s1869_s13 = sphi %s1917_s13, %s3623_s13   ;;  %s1865_s12 = sphi %s1915_s12, %s3622_s12  }
   0x3   : > { %p27_p1 = scmp.ge.s32.totalorder %s25_s15, 2  ;;  %p169_p2 = scmp.lt.s32.totalorder %s1873_s14, 3 }
   0x5   : > { %s3625_s15 = smov (%p27_p1, %s25_s15), 0  ;;  %p170_p3 = pnand %p1740_p0, %p169_p2 }
   0x7   : > { %173 = sbr.rel (%p170_p3) target bundleno = 795 (0x31b), region = 32 }
   0xe   : > { %vm227_vm0 = vcmask 31744   ;;  %vm246_vm1 = vcmask 24576   ;;  %p203_p4 = scmp.lt.s32.totalorder %s1865_s12, 1  ;;  %v3381_v0 = vmov 0.0   ;;  %vm229_vm2 = vcmask 25600   ;;  %s1876_s20 = smov 4  }
   0xf   : > { %231 = vst.msk [vmem:[#allocation2 + $0x10] sm:$0xff] %vm227_vm0, %v3381_v0  ;;  %228 = vst.msk [vmem:[#allocation2] sm:$0xff] %vm227_vm0, %v3381_v0  ;;  %vm516_vm3 = vcmask 1046528   ;;  %vm621_vm4 = vcmask 1045504   ;;  %s1877_s21 = smov 8   ;;  %s1878_s22 = smov 12  }
  0x10   : > { %233 = vst.msk [vmem:[#allocation2 + $0x140] sm:$0xff] %vm227_vm0, %v3381_v0  ;;  %235 = vst.msk [vmem:[#allocation2 + $0x150] sm:$0xff] %vm227_vm0, %v3381_v0  ;;  %s3627_s12 = smov (!%p203_p4, %s1865_s12), 1  ;;  %s1879_s23 = smov 16   ;;  %vm1060_vm5 = vcmask 64512   ;;  %vm1069_vm6 = vcmask 97280  }
  0x11   : > { %238 = vst.msk [vmem:[#allocation2 + $0x120] sm:$0xff] %vm227_vm0, %v3381_v0  ;;  %240 = vst.msk [vmem:[#allocation2 + $0x130] sm:$0xff] %vm227_vm0, %v3381_v0  ;;  %s1755_s16 = sshll.u32 %s3627_s12, 8  ;;  %s1880_s24 = smov 20   ;;  %vm3452_vm7 = vcmask 130048   ;;  %vm1087_vm8 = vcmask 162816  }
  0x12   : > { %249 = vst.msk [vmem:[#allocation2 + $0x20] sm:$0x1] %vm246_vm1, %v3381_v0  ;;  %250 = vst.msk [vmem:[#allocation2 + $0x30] sm:$0x1] %vm246_vm1, %v3381_v0  ;;  %s2115_s19 = scalar_lea.vmem %s3377_s0, %s1755_s16  ;;  %s1881_s25 = smov 24   ;;  %vm3454_vm9 = vcmask 195584  }
  0x13   : > { %251 = vst.msk [vmem:[#allocation2 + $0x40] sm:$0x1] %vm246_vm1, %v3381_v0  ;;  %252 = vst.msk [vmem:[#allocation2 + $0x50] sm:$0x1] %vm246_vm1, %v3381_v0  ;;  %v330_v1 = vld [vmem:[%s2115_s19 + $0x18] sm:$0xff]  ;;  %v328_v2 = vld [vmem:[%s2115_s19 + $0x8] sm:$0xff] }
  0x14   : > { %253 = vst.msk [vmem:[#allocation2 + $0x60] sm:$0x1] %vm246_vm1, %v3381_v0  ;;  %254 = vst.msk [vmem:[#allocation2 + $0x70] sm:$0x1] %vm246_vm1, %v3381_v0  ;;  %v332_v3 = vld [vmem:[%s2115_s19 + $0x28] sm:$0xff]  ;;  %v343_v4 = vld [vmem:[%s2115_s19 + $0x80] sm:$0xff] }
  0x15   : > { %255 = vst.msk [vmem:[#allocation2 + $0x80] sm:$0x1] %vm246_vm1, %v3381_v0  ;;  %256 = vst.msk [vmem:[#allocation2 + $0x90] sm:$0x1] %vm246_vm1, %v3381_v0  ;;  %v345_v5 = vld [vmem:[%s2115_s19 + $0x90] sm:$0xff]  ;;  %v344_v6 = vld [vmem:[%s2115_s19 + $0x88] sm:$0xff] }
  0x16   : > { %257 = vst.msk [vmem:[#allocation2 + $0xa0] sm:$0x1] %vm246_vm1, %v3381_v0  ;;  %258 = vst.msk [vmem:[#allocation2 + $0xb0] sm:$0x1] %vm246_vm1, %v3381_v0  ;;  %v346_v7 = vld [vmem:[%s2115_s19 + $0x98] sm:$0xff]  ;;  %v329_v8 = vld [vmem:[%s2115_s19 + $0x10] sm:$0xff] }
  0x17   : > { %259 = vst.msk [vmem:[#allocation2 + $0xc0] sm:$0x1] %vm246_vm1, %v3381_v0  ;;  %260 = vst.msk [vmem:[#allocation2 + $0xd0] sm:$0x1] %vm246_vm1, %v3381_v0  ;;  %v331_v9 = vld [vmem:[%s2115_s19 + $0x20] sm:$0xff]  ;;  %v349_v12 = vld [vmem:[%s2115_s19 + $0xb0] sm:$0xff] }
  0x18   : > { %261 = vst.msk [vmem:[#allocation2 + $0xe0] sm:$0x1] %vm246_vm1, %v3381_v0  ;;  %262 = vst.msk [vmem:[#allocation2 + $0xf0] sm:$0x1] %vm246_vm1, %v3381_v0  ;;  %v347_v11 = vld [vmem:[%s2115_s19 + $0xa0] sm:$0xff]  ;;  %v348_v13 = vld [vmem:[%s2115_s19 + $0xa8] sm:$0xff] }
  0x19   : > { %263 = vst.msk [vmem:[#allocation2 + $0x100] sm:$0x1] %vm246_vm1, %v3381_v0  ;;  %264 = vst.msk [vmem:[#allocation2 + $0x110] sm:$0x1] %vm246_vm1, %v3381_v0  ;;  %v350_v14 = vld [vmem:[%s2115_s19 + $0xb8] sm:$0xff]  ;;  %v333_v15 = vld [vmem:[%s2115_s19 + $0x30] sm:$0xff] }
  0x1a   : > { %269 = vst.msk [vmem:[#allocation2 + $0x160] sm:$0x1] %vm246_vm1, %v3381_v0  ;;  %270 = vst.msk [vmem:[#allocation2 + $0x170] sm:$0x1] %vm246_vm1, %v3381_v0  ;;  %v335_v16 = vld [vmem:[%s2115_s19 + $0x40] sm:$0xff]  ;;  %v334_v17 = vld [vmem:[%s2115_s19 + $0x38] sm:$0xff] }
  0x1b   : > { %271 = vst.msk [vmem:[#allocation2 + $0x180] sm:$0x1] %vm246_vm1, %v3381_v0  ;;  %272 = vst.msk [vmem:[#allocation2 + $0x190] sm:$0x1] %vm246_vm1, %v3381_v0  ;;  %v336_v18 = vld [vmem:[%s2115_s19 + $0x48] sm:$0xff]  ;;  %v351_v19 = vld [vmem:[%s2115_s19 + $0xc0] sm:$0xff] }
  0x1c   : > { %273 = vst.msk [vmem:[#allocation2 + $0x1a0] sm:$0x1] %vm246_vm1, %v3381_v0  ;;  %274 = vst.msk [vmem:[#allocation2 + $0x1b0] sm:$0x1] %vm246_vm1, %v3381_v0  ;;  %v353_v20 = vld [vmem:[%s2115_s19 + $0xd0] sm:$0xff]  ;;  %v352_v21 = vld [vmem:[%s2115_s19 + $0xc8] sm:$0xff] }
  0x1d   : > { %275 = vst.msk [vmem:[#allocation2 + $0x1c0] sm:$0x1] %vm246_vm1, %v3381_v0  ;;  %276 = vst.msk [vmem:[#allocation2 + $0x1d0] sm:$0x1] %vm246_vm1, %v3381_v0  ;;  %v354_v22 = vld [vmem:[%s2115_s19 + $0xd8] sm:$0xff]  ;;  %v337_v23 = vld [vmem:[%s2115_s19 + $0x50] sm:$0xff] }
  0x1e   : > { %277 = vst.msk [vmem:[#allocation2 + $0x1e0] sm:$0x1] %vm246_vm1, %v3381_v0  ;;  %278 = vst.msk [vmem:[#allocation2 + $0x1f0] sm:$0x1] %vm246_vm1, %v3381_v0  ;;  %v339_v24 = vld [vmem:[%s2115_s19 + $0x60] sm:$0xff]  ;;  %v338_v61 = vld [vmem:[%s2115_s19 + $0x58] sm:$0xff] }
  0x1f   : > { %279 = vst.msk [vmem:[#allocation2 + $0x200] sm:$0x1] %vm246_vm1, %v3381_v0  ;;  %280 = vst.msk [vmem:[#allocation2 + $0x210] sm:$0x1] %vm246_vm1, %v3381_v0  ;;  %v340_v62 = vld [vmem:[%s2115_s19 + $0x68] sm:$0xff]  ;;  %v355_v63 = vld [vmem:[%s2115_s19 + $0xe0] sm:$0xff] }
  0x20   : > { %281 = vst.msk [vmem:[#allocation2 + $0x220] sm:$0x1] %vm246_vm1, %v3381_v0  ;;  %282 = vst.msk [vmem:[#allocation2 + $0x230] sm:$0x1] %vm246_vm1, %v3381_v0  ;;  %s1882_s26 = smov 28   ;;  %s1883_s27 = smov 32  }
  0x21   : > { %283 = vst.msk [vmem:[#allocation2 + $0x240] sm:$0x1] %vm246_vm1, %v3381_v0  ;;  %284 = vst.msk [vmem:[#allocation2 + $0x250] sm:$0x1] %vm246_vm1, %v3381_v0  ;;  %s1884_s28 = smov 36   ;;  %s1885_s29 = smov 40  }
  0x22   : > { %289 = vst.msk [vmem:[#allocation2 + $0x29] sm:$0x1] %vm246_vm1, %v3381_v0  ;;  %290 = vst.msk [vmem:[#allocation2 + $0x39] sm:$0x1] %vm246_vm1, %v3381_v0  ;;  %s1886_s30 = smov 44   ;;  %s1887_s4 = smov 48  }
  0x23   : > { %291 = vst.msk [vmem:[#allocation2 + $0x49] sm:$0x1] %vm246_vm1, %v3381_v0  ;;  %292 = vst.msk [vmem:[#allocation2 + $0x59] sm:$0x1] %vm246_vm1, %v3381_v0  ;;  %s1888_s5 = smov 52   ;;  %s1889_s6 = smov 56  }
  0x24   : > { %293 = vst.msk [vmem:[#allocation2 + $0x69] sm:$0x1] %vm246_vm1, %v3381_v0  ;;  %294 = vst.msk [vmem:[#allocation2 + $0x79] sm:$0x1] %vm246_vm1, %v3381_v0  ;;  %s1890_s7 = smov 60   ;;  %vm3453_vm10 = vcmask 228352  }
  0x25   : > { %295 = vst.msk [vmem:[#allocation2 + $0x89] sm:$0x1] %vm246_vm1, %v3381_v0  ;;  %296 = vst.msk [vmem:[#allocation2 + $0x99] sm:$0x1] %vm246_vm1, %v3381_v0  ;;  %vm3449_vm11 = vcmask 261120   ;;  %s1891_s8 = smov 64  }
  0x26   : > { %297 = vst.msk [vmem:[#allocation2 + $0xa9] sm:$0x1] %vm246_vm1, %v3381_v0  ;;  %298 = vst.msk [vmem:[#allocation2 + $0xb9] sm:$0x1] %vm246_vm1, %v3381_v0  ;;  %vm1123_vm12 = vcmask 293888   ;;  %vm1132_vm13 = vcmask 326656  }
  0x27   : > { %299 = vst.msk [vmem:[#allocation2 + $0xc9] sm:$0x1] %vm246_vm1, %v3381_v0  ;;  %300 = vst.msk [vmem:[#allocation2 + $0xd9] sm:$0x1] %vm246_vm1, %v3381_v0  ;;  %vm1141_vm14 = vcmask 359424   ;;  %vm1150_vm15 = vcmask 392192  }
  0x28   : > { %301 = vst.msk [vmem:[#allocation2 + $0xe9] sm:$0x1] %vm246_vm1, %v3381_v0  ;;  %302 = vst.msk [vmem:[#allocation2 + $0xf9] sm:$0x1] %vm246_vm1, %v3381_v0  ;;  %s1743_s17 = sshll.u32 %s3627_s12, 2 }
  0x29   : > { %303 = vst.msk [vmem:[#allocation2 + $0x109] sm:$0x1] %vm246_vm1, %v3381_v0  ;;  %304 = vst.msk [vmem:[#allocation2 + $0x119] sm:$0x1] %vm246_vm1, %v3381_v0 }
  0x2a   : > { %309 = vst.msk [vmem:[#allocation2 + $0x169] sm:$0x1] %vm246_vm1, %v3381_v0  ;;  %310 = vst.msk [vmem:[#allocation2 + $0x179] sm:$0x1] %vm246_vm1, %v3381_v0 }
  0x2b   : > { %311 = vst.msk [vmem:[#allocation2 + $0x189] sm:$0x1] %vm246_vm1, %v3381_v0  ;;  %312 = vst.msk [vmem:[#allocation2 + $0x199] sm:$0x1] %vm246_vm1, %v3381_v0 }
  0x2c   : > { %313 = vst.msk [vmem:[#allocation2 + $0x1a9] sm:$0x1] %vm246_vm1, %v3381_v0  ;;  %314 = vst.msk [vmem:[#allocation2 + $0x1b9] sm:$0x1] %vm246_vm1, %v3381_v0 }
  0x2d   : > { %315 = vst.msk [vmem:[#allocation2 + $0x1c9] sm:$0x1] %vm246_vm1, %v3381_v0  ;;  %316 = vst.msk [vmem:[#allocation2 + $0x1d9] sm:$0x1] %vm246_vm1, %v3381_v0 }
  0x2e   : > { %317 = vst.msk [vmem:[#allocation2 + $0x1e9] sm:$0x1] %vm246_vm1, %v3381_v0  ;;  %318 = vst.msk [vmem:[#allocation2 + $0x1f9] sm:$0x1] %vm246_vm1, %v3381_v0 }
  0x2f   : > { %319 = vst.msk [vmem:[#allocation2 + $0x209] sm:$0x1] %vm246_vm1, %v3381_v0  ;;  %320 = vst.msk [vmem:[#allocation2 + $0x219] sm:$0x1] %vm246_vm1, %v3381_v0 }
  0x30   : > { %321 = vst.msk [vmem:[#allocation2 + $0x229] sm:$0x1] %vm246_vm1, %v3381_v0  ;;  %322 = vst.msk [vmem:[#allocation2 + $0x239] sm:$0x1] %vm246_vm1, %v3381_v0 }
  0x31   : > { %323 = vst.msk [vmem:[#allocation2 + $0x249] sm:$0x1] %vm246_vm1, %v3381_v0  ;;  %324 = vst.msk [vmem:[#allocation2 + $0x259] sm:$0x1] %vm246_vm1, %v3381_v0 }
  0x32   : > { %248 = vst.msk [vmem:[#allocation2 + $0x10] sm:$0x1] %vm246_vm1, %v3381_v0  ;;  %247 = vst.msk [vmem:[#allocation2] sm:$0x1] %vm246_vm1, %v3381_v0 }
  0x33   : > { %265 = vst.msk [vmem:[#allocation2 + $0x120] sm:$0x1] %vm246_vm1, %v3381_v0  ;;  %266 = vst.msk [vmem:[#allocation2 + $0x130] sm:$0x1] %vm246_vm1, %v3381_v0 }
  0x34   : > { %267 = vst.msk [vmem:[#allocation2 + $0x140] sm:$0x1] %vm246_vm1, %v3381_v0  ;;  %268 = vst.msk [vmem:[#allocation2 + $0x150] sm:$0x1] %vm246_vm1, %v3381_v0 }
  0x35   : > { %239 = vst.msk [vmem:[#allocation2 + $0x128] sm:$0x3] %vm229_vm2, %v3381_v0  ;;  %230 = vst.msk [vmem:[#allocation2 + $0x8] sm:$0x3] %vm229_vm2, %v3381_v0 }
  0x36   : > { %232 = vst.msk [vmem:[#allocation2 + $0x18] sm:$0x3] %vm229_vm2, %v3381_v0  ;;  %234 = vst.msk [vmem:[#allocation2 + $0x148] sm:$0x3] %vm229_vm2, %v3381_v0 }
  0x37   : > { %236 = vst.msk [vmem:[#allocation2 + $0x158] sm:$0x3] %vm229_vm2, %v3381_v0  ;;  %241 = vst.msk [vmem:[#allocation2 + $0x138] sm:$0x3] %vm229_vm2, %v3381_v0  ;;  %vm1168_vm2 = vcmask 457728  }
  0x38   : > { %305 = vst.msk [vmem:[#allocation2 + $0x129] sm:$0x1] %vm246_vm1, %v3381_v0  ;;  %287 = vst.msk [vmem:[#allocation2 + $0x9] sm:$0x1] %vm246_vm1, %v3381_v0 }
  0x39   : > { %288 = vst.msk [vmem:[#allocation2 + $0x19] sm:$0x1] %vm246_vm1, %v3381_v0  ;;  %306 = vst.msk [vmem:[#allocation2 + $0x139] sm:$0x1] %vm246_vm1, %v3381_v0  ;;  %v2132_v10 = vld [vmem:[#allocation2 + $0x10] sm:$0xff] }
  0x3a   : > { %307 = vst.msk [vmem:[#allocation2 + $0x149] sm:$0x1] %vm246_vm1, %v3381_v0  ;;  %308 = vst.msk [vmem:[#allocation2 + $0x159] sm:$0x1] %vm246_vm1, %v3381_v0  ;;  %476 = vrot.lane.b32.xlu0 %v2132_v10, %s1876_s20  ;;  %vm1159_vm1 = vcmask 424960  }
  0x3b   : > { %363 = vst.msk [vmem:[#allocation2 + $0x51] sm:$0xff] %vm227_vm0, %v330_v1  ;;  %361 = vst.msk [vmem:[#allocation2 + $0x31] sm:$0xff] %vm227_vm0, %v328_v2 }
  0x3c   : > { %365 = vst.msk [vmem:[#allocation2 + $0x71] sm:$0xff] %vm227_vm0, %v332_v3  ;;  %376 = vst.msk [vmem:[#allocation2 + $0x161] sm:$0xff] %vm227_vm0, %v343_v4  ;;  %v357_v3 = vld [vmem:[%s2115_s19 + $0xf0] sm:$0xff]  ;;  %v356_v4 = vld [vmem:[%s2115_s19 + $0xe8] sm:$0xff] }
  0x3d   : > { %378 = vst.msk [vmem:[#allocation2 + $0x181] sm:$0xff] %vm227_vm0, %v345_v5  ;;  %377 = vst.msk [vmem:[#allocation2 + $0x171] sm:$0xff] %vm227_vm0, %v344_v6 }
  0x3e   : > { %379 = vst.msk [vmem:[#allocation2 + $0x191] sm:$0xff] %vm227_vm0, %v346_v7  ;;  %362 = vst.msk [vmem:[#allocation2 + $0x41] sm:$0xff] %vm227_vm0, %v329_v8 }
  0x3f   : > { %364 = vst.msk [vmem:[#allocation2 + $0x61] sm:$0xff] %vm227_vm0, %v331_v9  ;;  %380 = vst.msk [vmem:[#allocation2 + $0x1a1] sm:$0xff] %vm227_vm0, %v347_v11  ;;  %v358_v9 = vld [vmem:[%s2115_s19 + $0xf8] sm:$0xff]  ;;  %v341_v11 = vld [vmem:[%s2115_s19 + $0x70] sm:$0xff] }
  0x40   : > { %382 = vst.msk [vmem:[#allocation2 + $0x1c1] sm:$0xff] %vm227_vm0, %v349_v12  ;;  %381 = vst.msk [vmem:[#allocation2 + $0x1b1] sm:$0xff] %vm227_vm0, %v348_v13  ;;  %v327_v12 = vld [vmem:[%s2115_s19] sm:$0xff]  ;;  %v342_v13 = vld [vmem:[%s2115_s19 + $0x78] sm:$0xff] }
  0x41   : > { %383 = vst.msk [vmem:[#allocation2 + $0x1d1] sm:$0xff] %vm227_vm0, %v350_v14  ;;  %366 = vst.msk [vmem:[#allocation2 + $0x81] sm:$0xff] %vm227_vm0, %v333_v15 }
  0x42   : > { %368 = vst.msk [vmem:[#allocation2 + $0xa1] sm:$0xff] %vm227_vm0, %v335_v16  ;;  %367 = vst.msk [vmem:[#allocation2 + $0x91] sm:$0xff] %vm227_vm0, %v334_v17  ;;  %v2164_v25 = vld [vmem:[#allocation2 + $0x50] sm:$0xff]  ;;  %v403_v60 = vld [vmem:[#allocation2 + $0x58] sm:$0x3] }
  0x43   : > { %369 = vst.msk [vmem:[#allocation2 + $0xb1] sm:$0xff] %vm227_vm0, %v336_v18  ;;  %384 = vst.msk [vmem:[#allocation2 + $0x1e1] sm:$0xff] %vm227_vm0, %v351_v19  ;;  %v2166_v26 = vld [vmem:[#allocation2 + $0x30] sm:$0xff]  ;;  %480 = vrot.lane.b32.xlu1 %v2164_v25, %s1876_s20  ;;  %v2177_v28 = vld [vmem:[#allocation2 + $0x160] sm:$0xff]  ;;  %v579_v1 = vrot.slane %v2164_v25, 1  ;;  %v580_v8 = vrot.slane %v403_v60, 1 }
  0x44   : > { %386 = vst.msk [vmem:[#allocation2 + $0x201] sm:$0xff] %vm227_vm0, %v353_v20  ;;  %385 = vst.msk [vmem:[#allocation2 + $0x1f1] sm:$0xff] %vm227_vm0, %v352_v21  ;;  %v2168_v27 = vld [vmem:[#allocation2 + $0x70] sm:$0xff]  ;;  %478 = vrot.lane.b32.xlu0 %v2166_v26, %s1876_s20  ;;  %v437_v29 = vld [vmem:[#allocation2 + $0x168] sm:$0x3]  ;;  %v745_v31 = vrot.slane %v2177_v28, 1 }
  0x45   : > { %3455 = vst [vmem:[#allocation4_spill] sm:$0xff] %v2168_v27  ;;  %387 = vst.msk [vmem:[#allocation2 + $0x211] sm:$0xff] %vm227_vm0, %v354_v22  ;;  %v2179_v30 = vld [vmem:[#allocation2 + $0x180] sm:$0xff]  ;;  %v746_v32 = vrot.slane %v437_v29, 1  ;;  %v441_v33 = vld [vmem:[#allocation2 + $0x188] sm:$0x3]  ;;  %v2266_v17 = vsel %vm516_vm3, %v579_v1, %v580_v8 }
  0x46   : > { %370 = vst.msk [vmem:[#allocation2 + $0xc1] sm:$0xff] %vm227_vm0, %v337_v23  ;;  %372 = vst.msk [vmem:[#allocation2 + $0xe1] sm:$0xff] %vm227_vm0, %v339_v24  ;;  %v748_v34 = vrot.slane %v2179_v30, 1  ;;  %v2183_v35 = vld [vmem:[#allocation2 + $0x170] sm:$0xff]  ;;  %v749_v36 = vrot.slane %v441_v33, 1  ;;  %v849_v44 = vrot.slane %v2177_v28, 2 }
  0x47   : > { %v439_v37 = vld [vmem:[#allocation2 + $0x178] sm:$0x3]  ;;  %v801_v38 = vrot.slane %v2183_v35, 1  ;;  %v2186_v39 = vld [vmem:[#allocation2 + $0x190] sm:$0xff]  ;;  %v2189_v40 = vsel %vm516_vm3, %v745_v31, %v746_v32  ;;  %482 = vrot.lane.b32.xlu1 %v2168_v27, %s1876_s20  ;;  %v850_v48 = vrot.slane %v437_v29, 2  ;;  %v852_v51 = vrot.slane %v2179_v30, 2 }
  0x48   : > { %v802_v41 = vrot.slane %v439_v37, 1  ;;  %v443_v42 = vld [vmem:[#allocation2 + $0x198] sm:$0x3]  ;;  %1190 = vrot.lane.b32.xlu0 %v2189_v40, %s1876_s20  ;;  %v804_v43 = vrot.slane %v2186_v39, 1  ;;  %v2198_v45 = vsel %vm516_vm3, %v748_v34, %v749_v36  ;;  %v853_v52 = vrot.slane %v441_v33, 2  ;;  %v2221_v54 = vld [vmem:[#allocation2 + $0x40] sm:$0xff] }
  0x49   : > { %v805_v47 = vrot.slane %v443_v42, 1  ;;  %v2211_v50 = vsel %vm621_vm4, %v849_v44, %v850_v48  ;;  %v401_v55 = vld [vmem:[#allocation2 + $0x48] sm:$0x3]  ;;  %v2227_v56 = vld [vmem:[#allocation2 + $0x60] sm:$0xff]  ;;  %v523_v57 = vrot.slane %v2221_v54, 1  ;;  %371 = vst.msk [vmem:[#allocation2 + $0xd1] sm:$0xff] %vm227_vm0, %v338_v61 }
  0x4a   : > { %v2201_v46 = vsel %vm516_vm3, %v801_v38, %v802_v41  ;;  %v2219_v53 = vsel %vm621_vm4, %v852_v51, %v853_v52  ;;  %v524_v58 = vrot.slane %v401_v55, 1  ;;  %v405_v59 = vld [vmem:[#allocation2 + $0x68] sm:$0x3]  ;;  %373 = vst.msk [vmem:[#allocation2 + $0xf1] sm:$0xff] %vm227_vm0, %v340_v62  ;;  %v407_v2 = vld [vmem:[#allocation2 + $0x78] sm:$0x3] }
  0x4b   : > { %1192 = vrot.lane.b32.xlu1 %v2198_v45, %s1876_s20  ;;  %v2208_v49 = vsel %vm516_vm3, %v804_v43, %v805_v47  ;;  %388 = vst.msk [vmem:[#allocation2 + $0x221] sm:$0xff] %vm227_vm0, %v355_v63  ;;  %v526_v6 = vrot.slane %v2227_v56, 1  ;;  %v527_v7 = vrot.slane %v405_v59, 1  ;;  %390 = vst.msk [vmem:[#allocation2 + $0x241] sm:$0xff] %vm227_vm0, %v357_v3  ;;  %v582_v14 = vrot.slane %v2168_v27, 1  ;;  %v2269_v20 = vld [vmem:[#allocation2 + $0x1a0] sm:$0xff] }
  0x4c   : > { %1219 = vrot.lane.b32.xlu0 %v2201_v46, %s1877_s21  ;;  %v2244_v5 = vsel %vm516_vm3, %v523_v57, %v524_v58  ;;  %389 = vst.msk [vmem:[#allocation2 + $0x231] sm:$0xff] %vm227_vm0, %v356_v4  ;;  %391 = vst.msk [vmem:[#allocation2 + $0x251] sm:$0xff] %vm227_vm0, %v358_v9  ;;  %v583_v15 = vrot.slane %v407_v2, 1  ;;  %v628_v18 = vrot.slane %v2221_v54, 2  ;;  %v629_v19 = vrot.slane %v401_v55, 2  ;;  %v2283_v33 = vld [vmem:[#allocation2 + $0x1c0] sm:$0xff] }
  0x4d   : > { %374 = vst.msk [vmem:[#allocation2 + $0x101] sm:$0xff] %vm227_vm0, %v341_v11  ;;  %360 = vst.msk [vmem:[#allocation2 + $0x21] sm:$0xff] %vm227_vm0, %v327_v12  ;;  %v2263_v16 = vsel %vm516_vm3, %v526_v6, %v527_v7  ;;  %v445_v21 = vld [vmem:[#allocation2 + $0x1a8] sm:$0x3]  ;;  %v631_v23 = vrot.slane %v2227_v56, 2  ;;  %v632_v29 = vrot.slane %v405_v59, 2 }
  0x4e   : > { %375 = vst.msk [vmem:[#allocation2 + $0x111] sm:$0xff] %vm227_vm0, %v342_v13  ;;  %v2276_v22 = vsel %vm516_vm3, %v582_v14, %v583_v15  ;;  %v2280_v24 = vsel %vm621_vm4, %v628_v18, %v629_v19  ;;  %v751_v31 = vrot.slane %v2269_v20, 1  ;;  %v752_v32 = vrot.slane %v445_v21, 1  ;;  %3456 = vst [vmem:[#allocation5_spill] sm:$0xff] %v2283_v33  ;;  %v449_v34 = vld [vmem:[#allocation2 + $0x1c8] sm:$0x3] }
  0x4f   : > { %1221 = vrot.lane.b32.xlu1 %v2208_v49, %s1877_s21  ;;  %v2285_v36 = vld [vmem:[#allocation2 + $0x1b0] sm:$0xff]  ;;  %v447_v37 = vld [vmem:[#allocation2 + $0x1b8] sm:$0x3]  ;;  %v754_v38 = vrot.slane %v2283_v33, 1  ;;  %v755_v41 = vrot.slane %v449_v34, 1  ;;  %v2293_v42 = vsel %vm621_vm4, %v631_v23, %v632_v29  ;;  %v573_v55 = vrot.slane %v2132_v10, 1 }
  0x50   : > { %1246 = vrot.lane.b32.xlu0 %v2211_v50, %s1878_s22  ;;  %v2296_v43 = vsel %vm516_vm3, %v751_v31, %v752_v32  ;;  %v807_v44 = vrot.slane %v2285_v36, 1  ;;  %v808_v47 = vrot.slane %v447_v37, 1  ;;  %v2299_v48 = vld [vmem:[#allocation2 + $0x1d0] sm:$0xff]  ;;  %v451_v51 = vld [vmem:[#allocation2 + $0x1d8] sm:$0x3]  ;;  %v855_v61 = vrot.slane %v2269_v20, 2 }
  0x51   : > { %3457 = vst [vmem:[#allocation6_spill] sm:$0xff] %v2299_v48  ;;  %v395_v52 = vld [vmem:[#allocation2 + $0x18] sm:$0x3]  ;;  %v2307_v57 = vsel %vm516_vm3, %v754_v38, %v755_v41  ;;  %v810_v58 = vrot.slane %v2299_v48, 1  ;;  %v811_v60 = vrot.slane %v451_v51, 1  ;;  %v856_v62 = vrot.slane %v445_v21, 2 }
  0x52   : > { %3458 = vst [vmem:[#allocation7_spill] sm:$0xff] %v2307_v57  ;;  %v2311_v59 = vsel %vm516_vm3, %v807_v44, %v808_v47  ;;  %v574_v63 = vrot.slane %v395_v52, 1  ;;  %v858_v3 = vrot.slane %v2283_v33, 2  ;;  %v859_v4 = vrot.slane %v449_v34, 2  ;;  %v2335_v7 = vld [vmem:[#allocation2 + $0x80] sm:$0xff]  ;;  %v2343_v11 = vld [vmem:[#allocation2 + $0x90] sm:$0xff] }
  0x53   : > { %1248 = vrot.lane.b32.xlu1 %v2219_v53, %s1878_s22  ;;  %v2322_v1 = vsel %vm516_vm3, %v810_v58, %v811_v60  ;;  %v2325_v2 = vsel %vm621_vm4, %v855_v61, %v856_v62  ;;  %3461 = vst [vmem:[#allocation10_spill] sm:$0xff] %v2335_v7  ;;  %v409_v8 = vld [vmem:[#allocation2 + $0x88] sm:$0x3]  ;;  %v2341_v9 = vld [vmem:[#allocation2 + $0xa0] sm:$0xff]  ;;  %v529_v12 = vrot.slane %v2335_v7, 1  ;;  %v2351_v19 = vld [vmem:[#allocation2 + $0xb0] sm:$0xff] }
  0x54   : > { %1271 = vrot.lane.b32.xlu0 %v2221_v54, %s1879_s23  ;;  %v2319_v10 = vsel %vm516_vm3, %v573_v55, %v574_v63  ;;  %3459 = vst [vmem:[#allocation8_spill] sm:$0xff] %v2322_v1  ;;  %v2333_v6 = vsel %vm621_vm4, %v858_v3, %v859_v4  ;;  %3462 = vst [vmem:[#allocation11_spill] sm:$0xff] %v2341_v9  ;;  %v530_v13 = vrot.slane %v409_v8, 1  ;;  %v413_v14 = vld [vmem:[#allocation2 + $0xa8] sm:$0x3]  ;;  %v532_v18 = vrot.slane %v2341_v9, 1 }
  0x55   : > { %3460 = vst [vmem:[#allocation9_spill] sm:$0xff] %v2333_v6  ;;  %v411_v15 = vld [vmem:[#allocation2 + $0x98] sm:$0x3]  ;;  %v533_v23 = vrot.slane %v413_v14, 1  ;;  %v585_v29 = vrot.slane %v2343_v11, 1  ;;  %v588_v34 = vrot.slane %v2351_v19, 1 }
  0x56   : > { %v2354_v21 = vsel %vm516_vm3, %v529_v12, %v530_v13  ;;  %v586_v31 = vrot.slane %v411_v15, 1  ;;  %v415_v32 = vld [vmem:[#allocation2 + $0xb8] sm:$0x3]  ;;  %v634_v44 = vrot.slane %v2335_v7, 2  ;;  %v635_v47 = vrot.slane %v409_v8, 2  ;;  %v2369_v51 = vld [vmem:[#allocation2 + $0x1e0] sm:$0xff] }
  0x57   : > { %1273 = vrot.lane.b32.xlu1 %v2227_v56, %s1879_s23  ;;  %v589_v37 = vrot.slane %v415_v32, 1  ;;  %v2363_v38 = vsel %vm516_vm3, %v532_v18, %v533_v23  ;;  %3464 = vst [vmem:[#allocation13_spill] sm:$0xff] %v2369_v51  ;;  %v453_v52 = vld [vmem:[#allocation2 + $0x1e8] sm:$0x3]  ;;  %v637_v58 = vrot.slane %v2341_v9, 2  ;;  %v638_v61 = vrot.slane %v413_v14, 2 }
  0x58   : > { %1296 = vrot.lane.b32.xlu0 %v2164_v25, %s1880_s24  ;;  %v2366_v41 = vsel %vm516_vm3, %v585_v29, %v586_v31  ;;  %v2380_v60 = vsel %vm621_vm4, %v634_v44, %v635_v47  ;;  %v757_v62 = vrot.slane %v2369_v51, 1  ;;  %v758_v63 = vrot.slane %v453_v52, 1  ;;  %v2383_v3 = vld [vmem:[#allocation2 + $0x200] sm:$0xff]  ;;  %v457_v4 = vld [vmem:[#allocation2 + $0x208] sm:$0x3]  ;;  %v2385_v8 = vld [vmem:[#allocation2 + $0x1f0] sm:$0xff] }
  0x59   : > { %3463 = vst [vmem:[#allocation12_spill] sm:$0xff] %v2366_v41  ;;  %v2376_v55 = vsel %vm516_vm3, %v588_v34, %v589_v37  ;;  %3466 = vst [vmem:[#allocation15_spill] sm:$0xff] %v2380_v60  ;;  %v455_v12 = vld [vmem:[#allocation2 + $0x1f8] sm:$0x3]  ;;  %v760_v13 = vrot.slane %v2383_v3, 1  ;;  %v761_v15 = vrot.slane %v457_v4, 1  ;;  %v2393_v14 = vsel %vm621_vm4, %v637_v58, %v638_v61 }
  0x5a   : > { %3465 = vst [vmem:[#allocation14_spill] sm:$0xff] %v2376_v55  ;;  %3467 = vst [vmem:[#allocation16_spill] sm:$0xff] %v2383_v3  ;;  %v2396_v18 = vsel %vm516_vm3, %v757_v62, %v758_v63  ;;  %v813_v23 = vrot.slane %v2385_v8, 1  ;;  %v814_v29 = vrot.slane %v455_v12, 1  ;;  %v2399_v31 = vld [vmem:[#allocation2 + $0x210] sm:$0xff]  ;;  %v861_v58 = vrot.slane %v2369_v51, 2 }
  0x5b   : > { %1298 = vrot.lane.b32.xlu1 %v2168_v27, %s1880_s24  ;;  %3468 = vst [vmem:[#allocation17_spill] sm:$0xff] %v2385_v8  ;;  %3469 = vst [vmem:[#allocation18_spill] sm:$0xff] %v2393_v14  ;;  %v459_v32 = vld [vmem:[#allocation2 + $0x218] sm:$0x3]  ;;  %v2406_v34 = vsel %vm516_vm3, %v760_v13, %v761_v15  ;;  %v816_v37 = vrot.slane %v2399_v31, 1  ;;  %v862_v61 = vrot.slane %v453_v52, 2 }
  0x5c   : > { %1324 = vrot.lane.b32.xlu0 %v2244_v5, %s1881_s25  ;;  %3470 = vst [vmem:[#allocation19_spill] sm:$0xff] %v2396_v18  ;;  %3471 = vst [vmem:[#allocation20_spill] sm:$0xff] %v2399_v31  ;;  %v2410_v44 = vsel %vm516_vm3, %v813_v23, %v814_v29  ;;  %v817_v47 = vrot.slane %v459_v32, 1  ;;  %v864_v12 = vrot.slane %v2383_v3, 2  ;;  %v865_v13 = vrot.slane %v457_v4, 2  ;;  %v2431_v15 = vld [vmem:[#allocation2 + $0xc0] sm:$0xff] }
  0x5d   : > { %3472 = vst [vmem:[#allocation21_spill] sm:$0xff] %v2406_v34  ;;  %3473 = vst [vmem:[#allocation22_spill] sm:$0xff] %v2410_v44  ;;  %v2421_v63 = vsel %vm621_vm4, %v861_v58, %v862_v61  ;;  %v417_v23 = vld [vmem:[#allocation2 + $0xc8] sm:$0x3]  ;;  %v2437_v29 = vld [vmem:[#allocation2 + $0xe0] sm:$0xff]  ;;  %v535_v32 = vrot.slane %v2431_v15, 1 }
  0x5e   : > { %v2418_v62 = vsel %vm516_vm3, %v816_v37, %v817_v47  ;;  %3475 = vst [vmem:[#allocation24_spill] sm:$0xff] %v2421_v63  ;;  %v2429_v52 = vsel %vm621_vm4, %v864_v12, %v865_v13  ;;  %3477 = vst [vmem:[#allocation26_spill] sm:$0xff] %v2431_v15  ;;  %v2439_v4 = vld [vmem:[#allocation2 + $0xd0] sm:$0xff]  ;;  %v536_v37 = vrot.slane %v417_v23, 1  ;;  %v421_v47 = vld [vmem:[#allocation2 + $0xe8] sm:$0x3] }
  0x5f   : > { %1326 = vrot.lane.b32.xlu1 %v2263_v16, %s1881_s25  ;;  %3474 = vst [vmem:[#allocation23_spill] sm:$0xff] %v2418_v62  ;;  %3476 = vst [vmem:[#allocation25_spill] sm:$0xff] %v2429_v52  ;;  %v419_v58 = vld [vmem:[#allocation2 + $0xd8] sm:$0x3]  ;;  %v538_v61 = vrot.slane %v2437_v29, 1  ;;  %v2447_v12 = vld [vmem:[#allocation2 + $0xf0] sm:$0xff] }
  0x60   : > { %1352 = vrot.lane.b32.xlu0 %v2266_v17, %s1882_s26  ;;  %3478 = vst [vmem:[#allocation27_spill] sm:$0xff] %v2437_v29  ;;  %3479 = vst [vmem:[#allocation28_spill] sm:$0xff] %v2439_v4  ;;  %v2450_v13 = vsel %vm516_vm3, %v535_v32, %v536_v37  ;;  %v539_v0 = vrot.slane %v421_v47, 1  ;;  %v640_v31 = vrot.slane %v2431_v15, 2  ;;  %v641_v3 = vrot.slane %v417_v23, 2 }
  0x61   : > { %3480 = vst [vmem:[#allocation29_spill] sm:$0xff] %v2447_v12  ;;  %3481 = vst [vmem:[#allocation30_spill] sm:$0xff] %v2450_v13  ;;  %v594_v37 = vrot.slane %v2447_v12, 1  ;;  %v643_v23 = vrot.slane %v2437_v29, 2  ;;  %v435_v48 = vld [vmem:[#allocation2 + $0x158] sm:$0x3] }
  0x62   : > { %v799_v51 = vrot.slane %v435_v48, 1 }
  0x63   : > { %1354 = vrot.lane.b32.xlu1 %v2276_v22, %s1882_s26 }
  0x64   : > { %1379 = vrot.lane.b32.xlu0 %v2280_v24, %s1883_s27 }
  0x67   : > { %1381 = vrot.lane.b32.xlu1 %v2293_v42, %s1883_s27 }
  0x68   : > { %1194 = vrot.lane.b32.xlu0 %v2296_v43, %s1876_s20 }
  0x6b   : > { %1196 = vrot.lane.b32.xlu1 %v2307_v57, %s1876_s20 }
  0x6c   : > { %1223 = vrot.lane.b32.xlu0 %v2311_v59, %s1877_s21 }
  0x6f   : > { %1225 = vrot.lane.b32.xlu1 %v2322_v1, %s1877_s21  ;;  %v2556_v1 = vld [vmem:[#allocation2] sm:$0xff] }
  0x70   : > { %1250 = vrot.lane.b32.xlu0 %v2325_v2, %s1878_s22  ;;  %3502 = vst [vmem:[#allocation51_spill] sm:$0xff] %v2556_v1 }
  0x73   : > { %1252 = vrot.lane.b32.xlu1 %v2333_v6, %s1878_s22  ;;  %v461_v6 = vld [vmem:[#allocation2 + $0x228] sm:$0x3] }
  0x74   : > { %1275 = vrot.lane.b32.xlu0 %v2335_v7, %s1879_s23 }
  0x77   : > { %1277 = vrot.lane.b32.xlu1 %v2341_v9, %s1879_s23  ;;  %v2459_v9 = vsel %vm516_vm3, %v538_v61, %v539_v0  ;;  %v2479_v61 = vld [vmem:[#allocation2 + $0x240] sm:$0xff] }
  0x78   : > { %1300 = vrot.lane.b32.xlu0 %v2343_v11, %s1880_s24  ;;  %3482 = vst [vmem:[#allocation31_spill] sm:$0xff] %v2459_v9  ;;  %3487 = vst [vmem:[#allocation36_spill] sm:$0xff] %v2479_v61 }
  0x7b   : > { %1302 = vrot.lane.b32.xlu1 %v2351_v19, %s1880_s24 }
  0x7c   : > { %1328 = vrot.lane.b32.xlu0 %v2354_v21, %s1881_s25 }
  0x7f   : > { %1330 = vrot.lane.b32.xlu1 %v2363_v38, %s1881_s25 }
  0x80   : > { %1356 = vrot.lane.b32.xlu0 %v2366_v41, %s1882_s26 }
  0x83   : > { %1358 = vrot.lane.b32.xlu1 %v2376_v55, %s1882_s26 }
  0x84   : > { %1383 = vrot.lane.b32.xlu0 %v2380_v60, %s1883_s27 }
  0x87   : > { %1385 = vrot.lane.b32.xlu1 %v2393_v14, %s1883_s27 }
  0x88   : > { %1198 = vrot.lane.b32.xlu0 %v2396_v18, %s1876_s20  ;;  %v576_v18 = vrot.slane %v2166_v26, 1 }
  0x8b   : > { %1200 = vrot.lane.b32.xlu1 %v2406_v34, %s1876_s20  ;;  %v423_v34 = vld [vmem:[#allocation2 + $0xf8] sm:$0x3] }
  0x8c   : > { %1227 = vrot.lane.b32.xlu0 %v2410_v44, %s1877_s21  ;;  %v393_v44 = vld [vmem:[#allocation2 + $0x8] sm:$0x3] }
  0x8f   : > { %1229 = vrot.lane.b32.xlu1 %v2418_v62, %s1877_s21  ;;  %v592_v62 = vrot.slane %v419_v58, 1  ;;  %v2465_v58 = vld [vmem:[#allocation2 + $0x220] sm:$0xff] }
  0x90   : > { %1254 = vrot.lane.b32.xlu0 %v2421_v63, %s1878_s22  ;;  %v595_v63 = vrot.slane %v423_v34, 1  ;;  %3484 = vst [vmem:[#allocation33_spill] sm:$0xff] %v2465_v58  ;;  %v763_v34 = vrot.slane %v2465_v58, 1 }
  0x92   : > { %v2473_v0 = vsel %vm516_vm3, %v594_v37, %v595_v63 }
  0x93   : > { %1256 = vrot.lane.b32.xlu1 %v2429_v52, %s1878_s22  ;;  %v591_v52 = vrot.slane %v2439_v4, 1  ;;  %3485 = vst [vmem:[#allocation34_spill] sm:$0xff] %v2473_v0 }
  0x94   : > { %1279 = vrot.lane.b32.xlu0 %v2431_v15, %s1879_s23  ;;  %v644_v15 = vrot.slane %v421_v47, 2 }
  0x95   : > { %v2462_v32 = vsel %vm516_vm3, %v591_v52, %v592_v62  ;;  %v2476_v62 = vsel %vm621_vm4, %v640_v31, %v641_v3  ;;  %v764_v52 = vrot.slane %v461_v6, 1  ;;  %v1187_v3 = vrot.slane %v2479_v61, 1 }
  0x96   : > { %3483 = vst [vmem:[#allocation32_spill] sm:$0xff] %v2462_v32  ;;  %3486 = vst [vmem:[#allocation35_spill] sm:$0xff] %v2476_v62  ;;  %v2488_v63 = vsel %vm621_vm4, %v643_v23, %v644_v15 }
  0x97   : > { %1281 = vrot.lane.b32.xlu1 %v2437_v29, %s1879_s23  ;;  %3489 = vst [vmem:[#allocation38_spill] sm:$0xff] %v2488_v63  ;;  %v2492_v31 = vsel %vm516_vm3, %v763_v34, %v764_v52  ;;  %v867_v52 = vrot.slane %v2465_v58, 2  ;;  %v431_v58 = vld [vmem:[#allocation2 + $0x138] sm:$0x3] }
  0x98   : > { %1304 = vrot.lane.b32.xlu0 %v2439_v4, %s1880_s24  ;;  %3490 = vst [vmem:[#allocation39_spill] sm:$0xff] %v2492_v31  ;;  %v467_v4 = vld [vmem:[#allocation2 + $0x258] sm:$0x3] }
  0x99   : > { %v1217_v23 = vrot.slane %v467_v4, 1  ;;  %v1243_v4 = vrot.slane %v2479_v61, 2 }
  0x9b   : > { %1306 = vrot.lane.b32.xlu1 %v2447_v12, %s1880_s24  ;;  %v2481_v12 = vld [vmem:[#allocation2 + $0x230] sm:$0xff] }
  0x9c   : > { %1332 = vrot.lane.b32.xlu0 %v2450_v13, %s1881_s25  ;;  %v465_v13 = vld [vmem:[#allocation2 + $0x248] sm:$0x3]  ;;  %3488 = vst [vmem:[#allocation37_spill] sm:$0xff] %v2481_v12  ;;  %v819_v37 = vrot.slane %v2481_v12, 1 }
  0x9d   : > { %v1188_v47 = vrot.slane %v465_v13, 1 }
  0x9f   : > { %1334 = vrot.lane.b32.xlu1 %v2459_v9, %s1881_s25  ;;  %v463_v9 = vld [vmem:[#allocation2 + $0x238] sm:$0x3] }
  0xa0   : > { %1360 = vrot.lane.b32.xlu0 %v2462_v32, %s1882_s26  ;;  %v820_v29 = vrot.slane %v463_v9, 1  ;;  %v2495_v32 = vld [vmem:[#allocation2 + $0x250] sm:$0xff]  ;;  %v868_v9 = vrot.slane %v461_v6, 2 }
  0xa1   : > { %3491 = vst [vmem:[#allocation40_spill] sm:$0xff] %v2495_v32  ;;  %v1216_v15 = vrot.slane %v2495_v32, 1  ;;  %v1244_v32 = vrot.slane %v465_v13, 2 }
  0xa2   : > { %v2504_v34 = vsel %vm516_vm3, %v819_v37, %v820_v29  ;;  %v2526_v37 = vld [vmem:[#allocation2 + $0x110] sm:$0xff] }
  0xa3   : > { %1362 = vrot.lane.b32.xlu1 %v2473_v0, %s1882_s26  ;;  %3492 = vst [vmem:[#allocation41_spill] sm:$0xff] %v2504_v34  ;;  %v1218_v12 = vsel %vm516_vm3, %v1216_v15, %v1217_v23  ;;  %v1245_v6 = vsel %vm621_vm4, %v1243_v4, %v1244_v32  ;;  %3496 = vst [vmem:[#allocation45_spill] sm:$0xff] %v2526_v37  ;;  %v427_v32 = vld [vmem:[#allocation2 + $0x118] sm:$0x3]  ;;  %v973_v4 = vrot.slane %v2526_v37, 1 }
  0xa4   : > { %1387 = vrot.lane.b32.xlu0 %v2476_v62, %s1883_s27  ;;  %v1189_v62 = vsel %vm516_vm3, %v1187_v3, %v1188_v47  ;;  %v425_v3 = vld [vmem:[#allocation2 + $0x108] sm:$0x3]  ;;  %v428_v47 = vld [vmem:[#allocation2 + $0x120] sm:$0xff] }
  0xa5   : > { %v946_v13 = vrot.slane %v425_v3, 1 }
  0xa7   : > { %1389 = vrot.lane.b32.xlu1 %v2488_v63, %s1883_s27 }
  0xa8   : > { %1202 = vrot.lane.b32.xlu0 %v2492_v31, %s1876_s20  ;;  %v2512_v31 = vsel %vm621_vm4, %v867_v52, %v868_v9  ;;  %v429_v52 = vld [vmem:[#allocation2 + $0x128] sm:$0x3]  ;;  %v1321_v9 = vrot.slane %v428_v47, 1 }
  0xa9   : > { %3493 = vst [vmem:[#allocation42_spill] sm:$0xff] %v2512_v31 }
  0xab   : > { %1204 = vrot.lane.b32.xlu1 %v1189_v62, %s1876_s20  ;;  %v2521_v62 = vld [vmem:[#allocation2 + $0x100] sm:$0xff] }
  0xac   : > { %1231 = vrot.lane.b32.xlu0 %v2504_v34, %s1877_s21  ;;  %v2518_v29 = vpop.permute.xlu0 %476  ;;  %3495 = vst [vmem:[#allocation44_spill] sm:$0xff] %v2521_v62  ;;  %v974_v34 = vrot.slane %v427_v32, 1 }
  0xad   : > { %3494 = vst [vmem:[#allocation43_spill] sm:$0xff] %v2518_v29 }
  0xae   : > { %v2549_v0 = vsel %vm516_vm3, %v973_v4, %v974_v34  ;;  %v1377_v34 = vrot.slane %v429_v52, 2 }
  0xaf   : > { %1233 = vrot.lane.b32.xlu1 %v1218_v12, %s1877_s21  ;;  %v945_v12 = vrot.slane %v2521_v62, 1  ;;  %3501 = vst [vmem:[#allocation50_spill] sm:$0xff] %v2549_v0 }
  0xb0   : > { %1258 = vrot.lane.b32.xlu0 %v2512_v31, %s1878_s22  ;;  %v1322_v31 = vrot.slane %v429_v52, 1 }
  0xb1   : > { %v2538_v61 = vsel %vm516_vm3, %v945_v12, %v946_v13  ;;  %v1000_v12 = vrot.slane %v2521_v62, 2  ;;  %v1001_v13 = vrot.slane %v425_v3, 2  ;;  %v517_v3 = vrot.slane %v2556_v1, 1 }
  0xb2   : > { %3499 = vst [vmem:[#allocation48_spill] sm:$0xff] %v2538_v61 }
  0xb3   : > { %1260 = vrot.lane.b32.xlu1 %v1245_v6, %s1878_s22  ;;  %v430_v6 = vld [vmem:[#allocation2 + $0x130] sm:$0xff] }
  0xb4   : > { %1283 = vrot.lane.b32.xlu0 %v2521_v62, %s1879_s23  ;;  %v1349_v63 = vrot.slane %v430_v6, 1  ;;  %v397_v62 = vld [vmem:[#allocation2 + $0x28] sm:$0x3] }
  0xb5   : > { %v2529_v15 = vpop.permute.xlu1 %480  ;;  %v521_v52 = vrot.slane %v397_v62, 1 }
  0xb6   : > { %3497 = vst [vmem:[#allocation46_spill] sm:$0xff] %v2529_v15  ;;  %v2531_v23 = vpop.permute.xlu0 %478  ;;  %v1350_v15 = vrot.slane %v431_v58, 1 }
  0xb7   : > { %3498 = vst [vmem:[#allocation47_spill] sm:$0xff] %v2531_v23  ;;  %1285 = vrot.lane.b32.xlu1 %v428_v47, %s1879_s23 }
  0xb8   : > { %1308 = vrot.lane.b32.xlu0 %v2526_v37, %s1880_s24  ;;  %v1323_v37 = vsel %vm516_vm3, %v1321_v9, %v1322_v31  ;;  %v1351_v58 = vsel %vm516_vm3, %v1349_v63, %v1350_v15  ;;  %v2563_v31 = vsel %vm621_vm4, %v1000_v12, %v1001_v13  ;;  %v518_v9 = vrot.slane %v393_v44, 1 }
  0xb9   : > { %v2540_v29 = vpop.permute.xlu1 %482  ;;  %3503 = vst [vmem:[#allocation52_spill] sm:$0xff] %v2563_v31 }
  0xba   : > { %3500 = vst [vmem:[#allocation49_spill] sm:$0xff] %v2540_v29  ;;  %v2542_v23 = vpop.permute.xlu0 %1190 }
  0xbb   : > { %1310 = vrot.lane.b32.xlu1 %v430_v6, %s1880_s24  ;;  %v1376_v6 = vrot.slane %v428_v47, 2  ;;  %v2570_v47 = vld [vmem:[#allocation2 + $0x20] sm:$0xff] }
  0xbc   : > { %1336 = vrot.lane.b32.xlu0 %v2538_v61, %s1881_s25  ;;  %v520_v15 = vrot.slane %v2570_v47, 1 }
  0xbd   : > { %v2552_v32 = vpop.permute.xlu1 %1192  ;;  %v1378_v63 = vsel %vm621_vm4, %v1376_v6, %v1377_v34  ;;  %v622_v6 = vrot.slane %v2556_v1, 2  ;;  %v623_v34 = vrot.slane %v393_v44, 2 }
  0xbe   : > { %v2554_v29 = vpop.permute.xlu0 %1219 }
  0xbf   : > { %1338 = vrot.lane.b32.xlu1 %v1323_v37, %s1881_s25  ;;  %v519_v37 = vsel %vm516_vm3, %v517_v3, %v518_v9 }
  0xc0   : > { %1364 = vrot.lane.b32.xlu0 %v2549_v0, %s1882_s26  ;;  %v399_v0 = vld [vmem:[#allocation2 + $0x38] sm:$0x3] }
  0xc1   : > { %v2566_v4 = vpop.permute.xlu1 %1221  ;;  %v577_v3 = vrot.slane %v399_v0, 1 }
  0xc2   : > { %v2568_v61 = vpop.permute.xlu0 %1246 }
  0xc3   : > { %1366 = vrot.lane.b32.xlu1 %v1351_v58, %s1882_s26  ;;  %v2586_v58 = vsel %vm516_vm3, %v520_v15, %v521_v52  ;;  %v625_v15 = vrot.slane %v2570_v47, 2  ;;  %v626_v52 = vrot.slane %v397_v62, 2 }
  0xc4   : > { %1391 = vrot.lane.b32.xlu0 %v2563_v31, %s1883_s27 }
  0xc5   : > { %v2578_v12 = vpop.permute.xlu1 %1248  ;;  %v2610_v1 = vsel %vm621_vm4, %v625_v15, %v626_v52 }
  0xc6   : > { %v2580_v13 = vpop.permute.xlu0 %1271 }
  0xc7   : > { %1393 = vrot.lane.b32.xlu1 %v1378_v63, %s1883_s27  ;;  %v624_v63 = vsel %vm621_vm4, %v622_v6, %v623_v34  ;;  %v433_v34 = vld [vmem:[#allocation2 + $0x148] sm:$0x3] }
  0xc8   : > { %541 = vrot.lane.b32.xlu0 %v519_v37, %s1877_s21  ;;  %v2599_v37 = vsel %vm516_vm3, %v576_v18, %v577_v3  ;;  %v434_v3 = vld [vmem:[#allocation2 + $0x150] sm:$0xff]  ;;  %v847_v27 = vrot.slane %v433_v34, 2 }
  0xc9   : > { %v2589_v9 = vpop.permute.xlu1 %1273  ;;  %v798_v15 = vrot.slane %v434_v3, 1 }
  0xca   : > { %v2591_v31 = vpop.permute.xlu0 %1296 }
  0xcb   : > { %543 = vrot.lane.b32.xlu1 %v2586_v58, %s1877_s21  ;;  %v800_v55 = vsel %vm516_vm3, %v798_v15, %v799_v51 }
  0xcc   : > { %597 = vrot.lane.b32.xlu0 %v2319_v10, %s1878_s22  ;;  %v432_v10 = vld [vmem:[#allocation2 + $0x140] sm:$0xff] }
  0xcd   : > { %v2602_v44 = vpop.permute.xlu1 %1298  ;;  %v742_v62 = vrot.slane %v432_v10, 1  ;;  %v846_v60 = vrot.slane %v432_v10, 2 }
  0xce   : > { %v2604_v0 = vpop.permute.xlu0 %1324 }
  0xcf   : > { %599 = vrot.lane.b32.xlu1 %v2599_v37, %s1878_s22  ;;  %v848_v48 = vsel %vm621_vm4, %v846_v60, %v847_v27  ;;  %vm3450_vm4 = vcmask 523264  }
  0xd0   : > { %646 = vrot.lane.b32.xlu0 %v624_v63, %s1879_s23  ;;  %v743_v63 = vrot.slane %v433_v34, 1 }
  0xd1   : > { %v2612_v6 = vpop.permute.xlu1 %1326 }
  0xd2   : > { %v2614_v18 = vpop.permute.xlu0 %1352  ;;  %v744_v52 = vsel %vm516_vm3, %v742_v62, %v743_v63  ;;  %vm3451_vm3 = vcmask 490496  }
  0xd3   : > { %648 = vrot.lane.b32.xlu1 %v2610_v1, %s1879_s23 }
  0xd4   : > { %678 = vrot.lane.b32.xlu0 %v432_v10, %s1880_s24 }
  0xd5   : > { %v2619_v57 = vpop.permute.xlu1 %1354 }
  0xd6   : > { %v2621_v8 = vpop.permute.xlu0 %1379 }
  0xd7   : > { %680 = vrot.lane.b32.xlu1 %v2177_v28, %s1880_s24 }
  0xd8   : > { %710 = vrot.lane.b32.xlu0 %v434_v3, %s1881_s25 }
  0xd9   : > { %v2627_v33 = vpop.permute.xlu1 %1381 }
  0xda   : > { %v2629_v14 = vpop.permute.xlu0 %1194 }
  0xdb   : > { %712 = vrot.lane.b32.xlu1 %v2183_v35, %s1881_s25 }
  0xdc   : > { %766 = vrot.lane.b32.xlu0 %v744_v52, %s1882_s26 }
  0xdd   : > { %v2635_v7 = vpop.permute.xlu1 %1196 }
  0xde   : > { %v2637_v41 = vpop.permute.xlu0 %1223 }
  0xdf   : > { %768 = vrot.lane.b32.xlu1 %v2189_v40, %s1882_s26 }
  0xe0   : > { %822 = vrot.lane.b32.xlu0 %v800_v55, %s1883_s27 }
  0xe1   : > { %v2643_v62 = vpop.permute.xlu1 %1225 }
  0xe2   : > { %v2645_v3 = vpop.permute.xlu0 %1250 }
  0xe3   : > { %824 = vrot.lane.b32.xlu1 %v2201_v46, %s1883_s27 }
  0xe4   : > { %870 = vrot.lane.b32.xlu0 %v848_v48, %s1884_s28 }
  0xe5   : > { %v2650_v51 = vpop.permute.xlu1 %1252 }
  0xe6   : > { %v2652_v10 = vpop.permute.xlu0 %1275 }
  0xe7   : > { %872 = vrot.lane.b32.xlu1 %v2211_v50, %s1884_s28 }
  0xe8   : > { %545 = vrot.lane.b32.xlu0 %v2244_v5, %s1877_s21 }
  0xe9   : > { %v2658_v27 = vpop.permute.xlu1 %1277 }
  0xea   : > { %v2660_v40 = vpop.permute.xlu0 %1300 }
  0xeb   : > { %547 = vrot.lane.b32.xlu1 %v2263_v16, %s1877_s21 }
  0xec   : > { %895 = vrot.lane.b32.xlu0 %v2570_v47, %s1885_s29 }
  0xed   : > { %v2666_v46 = vpop.permute.xlu1 %1302 }
  0xee   : > { %v2668_v55 = vpop.permute.xlu0 %1328 }
  0xef   : > { %897 = vrot.lane.b32.xlu1 %v2221_v54, %s1885_s29 }
  0xf0   : > { %601 = vrot.lane.b32.xlu0 %v2266_v17, %s1878_s22 }
  0xf1   : > { %v2674_v50 = vpop.permute.xlu1 %1330 }
  0xf2   : > { %v2676_v60 = vpop.permute.xlu0 %1356 }
  0xf3   : > { %603 = vrot.lane.b32.xlu1 %v2276_v22, %s1878_s22 }
  0xf4   : > { %920 = vrot.lane.b32.xlu0 %v2166_v26, %s1886_s30 }
  0xf5   : > { %v2682_v34 = vpop.permute.xlu1 %1358 }
  0xf6   : > { %v2684_v63 = vpop.permute.xlu0 %1383 }
  0xf7   : > { %922 = vrot.lane.b32.xlu1 %v2164_v25, %s1886_s30 }
  0xf8   : > { %650 = vrot.lane.b32.xlu0 %v2280_v24, %s1879_s23 }
  0xf9   : > { %v2690_v54 = vpop.permute.xlu1 %1385 }
  0xfa   : > { %v2692_v15 = vpop.permute.xlu0 %1198 }
  0xfb   : > { %652 = vrot.lane.b32.xlu1 %v2293_v42, %s1879_s23 }
  0xfc   : > { %948 = vrot.lane.b32.xlu0 %v2586_v58, %s1887_s4 }
  0xfd   : > { %v2698_v26 = vpop.permute.xlu1 %1200 }
  0xfe   : > { %3504 = vst [vmem:[#allocation53_spill] sm:$0xff] %v2698_v26  ;;  %v2700_v52 = vpop.permute.xlu0 %1227 }
  0xff   : > { %950 = vrot.lane.b32.xlu1 %v2244_v5, %s1887_s4 }
 0x100   : > { %682 = vrot.lane.b32.xlu0 %v2179_v30, %s1880_s24 }
 0x101   : > { %v2706_v25 = vpop.permute.xlu1 %1229 }
 0x102   : > { %3505 = vst [vmem:[#allocation54_spill] sm:$0xff] %v2706_v25  ;;  %v2708_v48 = vpop.permute.xlu0 %1254 }
 0x103   : > { %684 = vrot.lane.b32.xlu1 %v2269_v20, %s1880_s24 }
 0x104   : > { %976 = vrot.lane.b32.xlu0 %v2599_v37, %s1888_s5 }
 0x105   : > { %v2714_v58 = vpop.permute.xlu1 %1256 }
 0x106   : > { %3506 = vst [vmem:[#allocation55_spill] sm:$0xff] %v2714_v58  ;;  %v2716_v26 = vpop.permute.xlu0 %1279 }
 0x107   : > { %978 = vrot.lane.b32.xlu1 %v2266_v17, %s1888_s5  ;;  %v1403_v17 = vsel %vm227_vm0, %v2183_v35, %v2542_v23 }
 0x108   : > { %714 = vrot.lane.b32.xlu0 %v2186_v39, %s1881_s25 }
 0x109   : > { %v2722_v5 = vpop.permute.xlu1 %1281 }
 0x10a   : > { %3507 = vst [vmem:[#allocation56_spill] sm:$0xff] %v2722_v5  ;;  %v2724_v25 = vpop.permute.xlu0 %1304 }
 0x10b   : > { %716 = vrot.lane.b32.xlu1 %v2285_v36, %s1881_s25 }
 0x10c   : > { %1003 = vrot.lane.b32.xlu0 %v2610_v1, %s1889_s6 }
 0x10d   : > { %v2730_v37 = vpop.permute.xlu1 %1306 }
 0x10e   : > { %v2732_v58 = vpop.permute.xlu0 %1332 }
 0x10f   : > { %1005 = vrot.lane.b32.xlu1 %v2280_v24, %s1889_s6 }
 0x110   : > { %770 = vrot.lane.b32.xlu0 %v2198_v45, %s1882_s26  ;;  %v1411_v45 = vsel %vm1060_vm5, %v1403_v17, %v2554_v29 }
 0x111   : > { %v2741_v5 = vpop.permute.xlu1 %1334  ;;  %v1419_v35 = vsel %vm1069_vm6, %v1411_v45, %v2568_v61 }
 0x112   : > { %3508 = vst [vmem:[#allocation57_spill] sm:$0xff] %v2741_v5  ;;  %v2743_v1 = vpop.permute.xlu0 %1360  ;;  %v1427_v5 = vsel %vm3452_vm7, %v1419_v35, %v2580_v13  ;;  %v3520_v35 = vld [vmem:[#allocation12_spill] sm:$0xff] }
 0x113   : > { %772 = vrot.lane.b32.xlu1 %v2296_v43, %s1882_s26  ;;  %v1435_v43 = vsel %vm1087_vm8, %v1427_v5, %v2591_v31 }
 0x114   : > { %1028 = vrot.lane.b32.xlu0 %v2177_v28, %s1890_s7  ;;  %v1404_v28 = vsel %vm227_vm0, %v2186_v39, %v2552_v32  ;;  %v1443_v29 = vsel %vm3454_vm9, %v1435_v43, %v2604_v0  ;;  %v3447_v0 = vmov 0.0|0.0  }
 0x115   : > { %v2753_v24 = vpop.permute.xlu1 %1362  ;;  %v1412_v61 = vsel %vm1060_vm5, %v1404_v28, %v2566_v4  ;;  %v1451_v39 = vsel %vm3453_vm10, %v1443_v29, %v2614_v18  ;;  %1784 = vmatprep.subr.bf16.mxu0 %v3447_v0  ;;  %v3521_v28 = vld [vmem:[#allocation10_spill] sm:$0xff] }
 0x116   : > { %v2755_v23 = vpop.permute.xlu0 %1387  ;;  %v1420_v13 = vsel %vm1069_vm6, %v1412_v61, %v2578_v12  ;;  %v3524_v61 = vld [vmem:[#allocation4_spill] sm:$0xff] }
 0x117   : > { %1030 = vrot.lane.b32.xlu1 %v2179_v30, %s1890_s7  ;;  %v1459_v30 = vsel %vm3449_vm11, %v1451_v39, %v2621_v8  ;;  %v3528_v39 = vld [vmem:[#allocation15_spill] sm:$0xff] }
 0x118   : > { %826 = vrot.lane.b32.xlu0 %v2208_v49, %s1883_s27  ;;  %v1428_v49 = vsel %vm3452_vm7, %v1420_v13, %v2589_v9 }
 0x119   : > { %v2776_v32 = vpop.permute.xlu1 %1389  ;;  %v1436_v4 = vsel %vm1087_vm8, %v1428_v49, %v2602_v44 }
 0x11a   : > { %v2778_v31 = vpop.permute.xlu0 %1202  ;;  %v1444_v12 = vsel %vm3454_vm9, %v1436_v4, %v2612_v6  ;;  %v3530_v4 = vld [vmem:[#allocation18_spill] sm:$0xff] }
 0x11b   : > { %3509 = vst [vmem:[#allocation58_spill] sm:$0xff] %v2778_v31  ;;  %828 = vrot.lane.b32.xlu1 %v2311_v59, %s1883_s27  ;;  %v1452_v9 = vsel %vm3453_vm10, %v1444_v12, %v2619_v57 }
 0x11c   : > { %1475 = vrot.lane.b32.xlu0 %v1459_v30, %s1891_s8  ;;  %v1460_v44 = vsel %vm3449_vm11, %v1452_v9, %v2627_v33 }
 0x11d   : > { %v2794_v18 = vpop.permute.xlu1 %1204 }
 0x11e   : > { %3510 = vst [vmem:[#allocation59_spill] sm:$0xff] %v2794_v18  ;;  %v2796_v8 = vpop.permute.xlu0 %1231 }
 0x11f   : > { %3511 = vst [vmem:[#allocation60_spill] sm:$0xff] %v2796_v8  ;;  %1477 = vrot.lane.b32.xlu1 %v1460_v44, %s1891_s8  ;;  %v3531_v44 = vld [vmem:[#allocation5_spill] sm:$0xff] }
 0x120   : > { %484 = vrot.lane.b32.xlu0 %v2343_v11, %s1876_s20  ;;  %v3551_v8 = vld [vmem:[#allocation49_spill] sm:$0xff] }
 0x121   : > { %v2803_v59 = vpop.permute.xlu1 %1233 }
 0x122   : > { %3512 = vst [vmem:[#allocation61_spill] sm:$0xff] %v2803_v59  ;;  %v2805_v6 = vpop.permute.xlu0 %1258 }
 0x123   : > { %3513 = vst [vmem:[#allocation62_spill] sm:$0xff] %v2805_v6  ;;  %486 = vrot.lane.b32.xlu1 %v2351_v19, %s1876_s20  ;;  %v1846_v6 = vld [vmem:[#allocation2 + $0x60] sm:$0xff] }
 0x124   : > { %874 = vrot.lane.b32.xlu0 %v2219_v53, %s1884_s28  ;;  %v1055_v31 = vsel %vm227_vm0, %v1846_v6, %v3551_v8 }
 0x125   : > { %v2811_v57 = vpop.permute.xlu1 %1260 }
 0x126   : > { %3514 = vst [vmem:[#allocation63_spill] sm:$0xff] %v2811_v57  ;;  %v2813_v5 = vpop.permute.xlu0 %1283 }
 0x127   : > { %3515 = vst [vmem:[#allocation64_spill] sm:$0xff] %v2813_v5  ;;  %876 = vrot.lane.b32.xlu1 %v2325_v2, %s1884_s28  ;;  %v3550_v5 = vld [vmem:[#allocation35_spill] sm:$0xff] }
 0x128   : > { %549 = vrot.lane.b32.xlu0 %v2354_v21, %s1877_s21 }
 0x129   : > { %v2819_v33 = vpop.permute.xlu1 %1285 }
 0x12a   : > { %3516 = vst [vmem:[#allocation65_spill] sm:$0xff] %v2819_v33  ;;  %v2821_v17 = vpop.permute.xlu0 %1308 }
 0x12b   : > { %3517 = vst [vmem:[#allocation66_spill] sm:$0xff] %v2821_v17  ;;  %551 = vrot.lane.b32.xlu1 %v2363_v38, %s1877_s21 }
 0x12c   : > { %899 = vrot.lane.b32.xlu0 %v2227_v56, %s1885_s29  ;;  %v3525_v56 = vld [vmem:[#allocation14_spill] sm:$0xff] }
 0x12d   : > { %v2827_v53 = vpop.permute.xlu1 %1310 }
 0x12e   : > { %3518 = vst [vmem:[#allocation67_spill] sm:$0xff] %v2827_v53  ;;  %v2829_v45 = vpop.permute.xlu0 %1336 }
 0x12f   : > { %3519 = vst [vmem:[#allocation68_spill] sm:$0xff] %v2829_v45  ;;  %901 = vrot.lane.b32.xlu1 %v3521_v28, %s1885_s29 }
 0x130   : > { %605 = vrot.lane.b32.xlu0 %v3520_v35, %s1878_s22 }
 0x131   : > { %v2835_v2 = vpop.permute.xlu1 %1338 }
 0x132   : > { %3522 = vst [vmem:[#allocation12_spill] sm:$0xff] %v2835_v2  ;;  %v2837_v43 = vpop.permute.xlu0 %1364 }
 0x133   : > { %3523 = vst [vmem:[#allocation10_spill] sm:$0xff] %v2837_v43  ;;  %607 = vrot.lane.b32.xlu1 %v3525_v56, %s1878_s22  ;;  %v3536_v43 = vld [vmem:[#allocation19_spill] sm:$0xff] }
 0x134   : > { %924 = vrot.lane.b32.xlu0 %v3524_v61, %s1886_s30 }
 0x135   : > { %v2843_v29 = vpop.permute.xlu1 %1366 }
 0x136   : > { %3526 = vst [vmem:[#allocation4_spill] sm:$0xff] %v2843_v29  ;;  %v2845_v13 = vpop.permute.xlu0 %1391 }
 0x137   : > { %3527 = vst [vmem:[#allocation14_spill] sm:$0xff] %v2845_v13  ;;  %926 = vrot.lane.b32.xlu1 %v2343_v11, %s1886_s30  ;;  %v3535_v13 = vld [vmem:[#allocation7_spill] sm:$0xff] }
 0x138   : > { %654 = vrot.lane.b32.xlu0 %v3528_v39, %s1879_s23 }
 0x139   : > { %v2851_v49 = vpop.permute.xlu1 %1393 }
 0x13a   : > { %3529 = vst [vmem:[#allocation15_spill] sm:$0xff] %v2851_v49  ;;  %v2853_v30 = vpop.permute.xlu0 %541  ;;  %v3533_v49 = vld [vmem:[#allocation6_spill] sm:$0xff] }
 0x13b   : > { %656 = vrot.lane.b32.xlu1 %v3530_v4, %s1879_s23 }
 0x13c   : > { %952 = vrot.lane.b32.xlu0 %v2263_v16, %s1887_s4  ;;  %v3532_v16 = vld [vmem:[#allocation13_spill] sm:$0xff] }
 0x13d   : > { %v2861_v9 = vpop.permute.xlu1 %543 }
 0x13e   : > { %v2859_v12 = vpop.permute.xlu0 %597 }
 0x13f   : > { %954 = vrot.lane.b32.xlu1 %v2354_v21, %s1887_s4 }
 0x140   : > { %686 = vrot.lane.b32.xlu0 %v3531_v44, %s1880_s24 }
 0x141   : > { %v2869_v28 = vpop.permute.xlu1 %599 }
 0x142   : > { %v2867_v11 = vpop.permute.xlu0 %646 }
 0x143   : > { %688 = vrot.lane.b32.xlu1 %v3532_v16, %s1880_s24 }
 0x144   : > { %980 = vrot.lane.b32.xlu0 %v2276_v22, %s1888_s5  ;;  %v3534_v22 = vld [vmem:[#allocation17_spill] sm:$0xff] }
 0x145   : > { %v2877_v0 = vpop.permute.xlu1 %648 }
 0x146   : > { %v2875_v61 = vpop.permute.xlu0 %678 }
 0x147   : > { %982 = vrot.lane.b32.xlu1 %v3520_v35, %s1888_s5  ;;  %v1405_v35 = vsel %vm227_vm0, %v2285_v36, %v2629_v14 }
 0x148   : > { %718 = vrot.lane.b32.xlu0 %v3533_v49, %s1881_s25 }
 0x149   : > { %v2885_v29 = vpop.permute.xlu1 %680 }
 0x14a   : > { %v2883_v21 = vpop.permute.xlu0 %710 }
 0x14b   : > { %720 = vrot.lane.b32.xlu1 %v3534_v22, %s1881_s25 }
 0x14c   : > { %1007 = vrot.lane.b32.xlu0 %v2293_v42, %s1889_s6 }
 0x14d   : > { %v2893_v53 = vpop.permute.xlu1 %712 }
 0x14e   : > { %v2891_v2 = vpop.permute.xlu0 %766 }
 0x14f   : > { %1009 = vrot.lane.b32.xlu1 %v3528_v39, %s1889_s6 }
 0x150   : > { %774 = vrot.lane.b32.xlu0 %v3535_v13, %s1882_s26  ;;  %v1413_v13 = vsel %vm1060_vm5, %v1405_v35, %v2637_v41 }
 0x151   : > { %v2904_v42 = vpop.permute.xlu1 %768  ;;  %v1421_v39 = vsel %vm1069_vm6, %v1413_v13, %v2645_v3 }
 0x152   : > { %v2902_v33 = vpop.permute.xlu0 %822  ;;  %v1429_v36 = vsel %vm3452_vm7, %v1421_v39, %v2652_v10  ;;  %v3539_v39 = vld [vmem:[#allocation28_spill] sm:$0xff] }
 0x153   : > { %776 = vrot.lane.b32.xlu1 %v3536_v43, %s1882_s26  ;;  %v1437_v14 = vsel %vm1087_vm8, %v1429_v36, %v2660_v40  ;;  %v3537_v43 = vld [vmem:[#allocation8_spill] sm:$0xff] }
 0x154   : > { %1032 = vrot.lane.b32.xlu0 %v2269_v20, %s1890_s7  ;;  %v1406_v20 = vsel %vm227_vm0, %v3533_v49, %v2635_v7  ;;  %v1445_v3 = vsel %vm3454_vm9, %v1437_v14, %v2668_v55  ;;  %v3538_v55 = vld [vmem:[#allocation22_spill] sm:$0xff] }
 0x155   : > { %v2916_v45 = vpop.permute.xlu1 %824  ;;  %v1414_v41 = vsel %vm1060_vm5, %v1406_v20, %v2643_v62  ;;  %v1453_v7 = vsel %vm3453_vm10, %v1445_v3, %v2676_v60  ;;  %v3540_v20 = vld [vmem:[#allocation9_spill] sm:$0xff] }
 0x156   : > { %v2914_v57 = vpop.permute.xlu0 %870  ;;  %v1422_v10 = vsel %vm1069_vm6, %v1414_v41, %v2650_v51 }
 0x157   : > { %1034 = vrot.lane.b32.xlu1 %v3531_v44, %s1890_s7  ;;  %v1430_v35 = vsel %vm3452_vm7, %v1422_v10, %v2658_v27  ;;  %v1461_v44 = vsel %vm3449_vm11, %v1453_v7, %v2684_v63  ;;  %v3544_v10 = vld [vmem:[#allocation11_spill] sm:$0xff] }
 0x158   : > { %830 = vrot.lane.b32.xlu0 %v3537_v43, %s1883_s27  ;;  %v1438_v62 = vsel %vm1087_vm8, %v1430_v35, %v2666_v46  ;;  %v3542_v43 = vld [vmem:[#allocation30_spill] sm:$0xff]  ;;  %v3545_v7 = vld [vmem:[#allocation31_spill] sm:$0xff] }
 0x159   : > { %v2937_v40 = vpop.permute.xlu1 %872  ;;  %v1446_v51 = vsel %vm3454_vm9, %v1438_v62, %v2674_v50  ;;  %v3541_v50 = vld [vmem:[#allocation29_spill] sm:$0xff]  ;;  %v3546_v62 = vld [vmem:[#allocation32_spill] sm:$0xff] }
 0x15a   : > { %v546_v49 = vpop.permute.xlu0 %545  ;;  %v1454_v60 = vsel %vm3453_vm10, %v1446_v51, %v2682_v34 }
 0x15b   : > { %832 = vrot.lane.b32.xlu1 %v3538_v55, %s1883_s27  ;;  %v1462_v63 = vsel %vm3449_vm11, %v1454_v60, %v2690_v54  ;;  %v3543_v54 = vld [vmem:[#allocation24_spill] sm:$0xff]  ;;  %v3547_v55 = vld [vmem:[#allocation26_spill] sm:$0xff] }
 0x15c   : > { %1479 = vrot.lane.b32.xlu0 %v1461_v44, %s1891_s8 }
 0x15d   : > { %v548_v27 = vpop.permute.xlu1 %547 }
 0x15e   : > { %v2952_v13 = vpop.permute.xlu0 %895 }
 0x15f   : > { %1481 = vrot.lane.b32.xlu1 %v1462_v63, %s1891_s8  ;;  %v3548_v63 = vld [vmem:[#allocation34_spill] sm:$0xff] }
 0x160   : > { %488 = vrot.lane.b32.xlu0 %v3539_v39, %s1876_s20 }
 0x161   : > { %v2959_v36 = vpop.permute.xlu1 %897 }
 0x162   : > { %v602_v46 = vpop.permute.xlu0 %601 }
 0x163   : > { %490 = vrot.lane.b32.xlu1 %v3541_v50, %s1876_s20  ;;  %s222_s20 = scalar_lea.vmem %s3380_s3, %s1743_s17 }
 0x164   : > { %878 = vrot.lane.b32.xlu0 %v3540_v20, %s1884_s28  ;;  %v1845_v20 = vld [vmem:[#allocation2 + $0x40] sm:$0xff] }
 0x165   : > { %v604_v14 = vpop.permute.xlu1 %603 }
 0x166   : > { %v2965_v34 = vpop.permute.xlu0 %920 }
 0x167   : > { %880 = vrot.lane.b32.xlu1 %v3543_v54, %s1884_s28  ;;  %v3549_v54 = vld [vmem:[#allocation46_spill] sm:$0xff] }
 0x168   : > { %553 = vrot.lane.b32.xlu0 %v3542_v43, %s1877_s21 }
 0x169   : > { %v2971_v3 = vpop.permute.xlu1 %922 }
 0x16a   : > { %v651_v41 = vpop.permute.xlu0 %650 }
 0x16b   : > { %555 = vrot.lane.b32.xlu1 %v3545_v7, %s1877_s21 }
 0x16c   : > { %903 = vrot.lane.b32.xlu0 %v3544_v10, %s1885_s29  ;;  %v1054_v10 = vsel %vm227_vm0, %v1845_v20, %v3549_v54 }
 0x16d   : > { %v653_v44 = vpop.permute.xlu1 %652  ;;  %v1063_v18 = vsel %vm1060_vm5, %v1054_v10, %v546_v49  ;;  %v1064_v49 = vsel %vm1060_vm5, %v1055_v31, %v548_v27  ;;  %v3554_v31 = vld [vmem:[#allocation51_spill] sm:$0xff] }
 0x16e   : > { %v2977_v35 = vpop.permute.xlu0 %948 }
 0x16f   : > { %905 = vrot.lane.b32.xlu1 %v3547_v55, %s1885_s29  ;;  %v1072_v55 = vsel %vm1069_vm6, %v1063_v18, %v602_v46  ;;  %v1073_v46 = vsel %vm1069_vm6, %v1064_v49, %v604_v14  ;;  %v3555_v14 = vld [vmem:[#allocation16_spill] sm:$0xff]  ;;  %v3556_v49 = vld [vmem:[#allocation47_spill] sm:$0xff] }
 0x170   : > { %609 = vrot.lane.b32.xlu0 %v3546_v62, %s1878_s22 }
 0x171   : > { %v2983_v60 = vpop.permute.xlu1 %950 }
 0x172   : > { %v683_v51 = vpop.permute.xlu0 %682 }
 0x173   : > { %611 = vrot.lane.b32.xlu1 %v3548_v63, %s1878_s22 }
 0x174   : > { %928 = vrot.lane.b32.xlu0 %v2351_v19, %s1886_s30  ;;  %v1081_v19 = vsel %vm3452_vm7, %v1072_v55, %v651_v41  ;;  %v1082_v41 = vsel %vm3452_vm7, %v1073_v46, %v653_v44  ;;  %v3553_v55 = vld [vmem:[#allocation43_spill] sm:$0xff]  ;;  %v1053_v46 = vsel %vm227_vm0, %v2570_v47, %v3556_v49 }
 0x175   : > { %v685_v17 = vpop.permute.xlu1 %684  ;;  %v1090_v20 = vsel %vm1087_vm8, %v1081_v19, %v683_v51  ;;  %v1052_v27 = vsel %vm227_vm0, %v3554_v31, %v3553_v55 }
 0x176   : > { %v2991_v59 = vpop.permute.xlu0 %976  ;;  %v1091_v8 = vsel %vm1087_vm8, %v1082_v41, %v685_v17 }
 0x177   : > { %930 = vrot.lane.b32.xlu1 %v3539_v39, %s1886_s30  ;;  %v3552_v39 = vld [vmem:[#allocation38_spill] sm:$0xff] }
 0x178   : > { %658 = vrot.lane.b32.xlu0 %v3550_v5, %s1879_s23 }
 0x179   : > { %v3003_v63 = vpop.permute.xlu1 %978 }
 0x17a   : > { %v715_v54 = vpop.permute.xlu0 %714 }
 0x17b   : > { %v1099_v18 = vsel %vm3454_vm9, %v1090_v20, %v715_v54  ;;  %660 = vrot.lane.b32.xlu1 %v3552_v39, %s1879_s23 }
 0x17c   : > { %956 = vrot.lane.b32.xlu0 %v2363_v38, %s1887_s4  ;;  %v1061_v38 = vsel %vm1060_vm5, %v1052_v27, %v2853_v30  ;;  %v3557_v30 = vld [vmem:[#allocation33_spill] sm:$0xff] }
 0x17d   : > { %v717_v51 = vpop.permute.xlu1 %716  ;;  %v1070_v17 = vsel %vm1069_vm6, %v1061_v38, %v2859_v12  ;;  %v1062_v12 = vsel %vm1060_vm5, %v1053_v46, %v2861_v9  ;;  %v3562_v46 = vld [vmem:[#allocation53_spill] sm:$0xff] }
 0x17e   : > { %v1004_v6 = vpop.permute.xlu0 %1003  ;;  %v1100_v10 = vsel %vm3454_vm9, %v1091_v8, %v717_v51  ;;  %v1079_v20 = vsel %vm3452_vm7, %v1070_v17, %v2867_v11 }
 0x17f   : > { %958 = vrot.lane.b32.xlu1 %v3542_v43, %s1887_s4  ;;  %v1088_v43 = vsel %vm1087_vm8, %v1079_v20, %v2875_v61  ;;  %v3561_v20 = vld [vmem:[#allocation39_spill] sm:$0xff] }
 0x180   : > { %690 = vrot.lane.b32.xlu0 %v3555_v14, %s1880_s24  ;;  %v1097_v11 = vsel %vm3454_vm9, %v1088_v43, %v2883_v21 }
 0x181   : > { %v1006_v19 = vpop.permute.xlu1 %1005  ;;  %v1106_v47 = vsel %vm3453_vm10, %v1097_v11, %v2891_v2  ;;  %v3558_v2 = vld [vmem:[#allocation20_spill] sm:$0xff] }
 0x182   : > { %v771_v44 = vpop.permute.xlu0 %770  ;;  %v1115_v8 = vsel %vm3449_vm11, %v1106_v47, %v2902_v33  ;;  %v1408_v43 = vsel %vm227_vm0, %v3558_v2, %v3562_v46 }
 0x183   : > { %v3029_v54 = vsel %vm3453_vm10, %v1099_v18, %v771_v44  ;;  %692 = vrot.lane.b32.xlu1 %v3557_v30, %s1880_s24  ;;  %v1071_v18 = vsel %vm1069_vm6, %v1062_v12, %v2869_v28  ;;  %v1124_v28 = vsel %vm1123_vm12, %v1115_v8, %v2914_v57  ;;  %v3563_v12 = vld [vmem:[#allocation23_spill] sm:$0xff]  ;;  %v3566_v8 = vld [vmem:[#allocation56_spill] sm:$0xff] }
 0x184   : > { %984 = vrot.lane.b32.xlu0 %v3525_v56, %s1888_s5  ;;  %v1080_v56 = vsel %vm3452_vm7, %v1071_v18, %v2877_v0  ;;  %v1133_v33 = vsel %vm1132_vm13, %v1124_v28, %v2952_v13 }
 0x185   : > { %v773_v41 = vpop.permute.xlu1 %772  ;;  %v1089_v21 = vsel %vm1087_vm8, %v1080_v56, %v2885_v29  ;;  %v1142_v57 = vsel %vm1141_vm14, %v1133_v33, %v2965_v34  ;;  %v3559_v34 = vld [vmem:[#allocation37_spill] sm:$0xff] }
 0x186   : > { %v1029_v61 = vpop.permute.xlu0 %1028  ;;  %v3053_v9 = vsel %vm3453_vm10, %v1100_v10, %v773_v41  ;;  %v1098_v0 = vsel %vm3454_vm9, %v1089_v21, %v2893_v53  ;;  %v1151_v53 = vsel %vm1150_vm15, %v1142_v57, %v2977_v35  ;;  %v3570_v33 = vld [vmem:[#allocation41_spill] sm:$0xff] }
 0x187   : > { %986 = vrot.lane.b32.xlu1 %v3546_v62, %s1888_s5  ;;  %v1107_v29 = vsel %vm3453_vm10, %v1098_v0, %v2904_v42  ;;  %v1160_v42 = vsel %vm1159_vm1, %v1151_v53, %v2991_v59 }
 0x188   : > { %722 = vrot.lane.b32.xlu0 %v3558_v2, %s1881_s25  ;;  %v1116_v62 = vsel %vm3449_vm11, %v1107_v29, %v2916_v45  ;;  %v1169_v55 = vsel %vm1168_vm2, %v1160_v42, %v1004_v6  ;;  %vm1508_vm11 = vcmask 818176   ;;  %v1407_v6 = vsel %vm227_vm0, %v3534_v22, %v2692_v15 }
 0x189   : > { %v1031_v10 = vpop.permute.xlu1 %1030  ;;  %v1125_v13 = vsel %vm1123_vm12, %v1116_v62, %v2937_v40  ;;  %v1178_v40 = vsel %vm3451_vm3, %v1169_v55, %v1029_v61  ;;  %v1847_v61 = vld [vmem:[#allocation2 + $0x80] sm:$0xff]  ;;  %v3572_v55 = vmov 0.0|0.0  }
 0x18a   : > { %v3071_v51 = vpop.permute.xlu0 %826  ;;  %v1134_v45 = vsel %vm1132_vm13, %v1125_v13, %v2959_v36  ;;  %v3560_v36 = vld [vmem:[#allocation21_spill] sm:$0xff]  ;;  %v1848_v62 = vld [vmem:[#allocation2 + $0xa0] sm:$0xff] }
 0x18b   : > { %724 = vrot.lane.b32.xlu1 %v3559_v34, %s1881_s25  ;;  %v1143_v35 = vsel %vm1141_vm14, %v1134_v45, %v2971_v3 }
 0x18c   : > { %1011 = vrot.lane.b32.xlu0 %v3530_v4, %s1889_s6  ;;  %v1152_v4 = vsel %vm1150_vm15, %v1143_v35, %v2983_v60  ;;  %v3573_v35 = vld [vmem:[#allocation25_spill] sm:$0xff] }
 0x18d   : > { %v3091_v59 = vpop.permute.xlu1 %828  ;;  %v1161_v38 = vsel %vm1159_vm1, %v1152_v4, %v3003_v63  ;;  %v3574_v4 = vld [vmem:[#allocation27_spill] sm:$0xff] }
 0x18e   : > { %v1476_v31 = vpop.permute.xlu0 %1475  ;;  %v1170_v3 = vsel %vm1168_vm2, %v1161_v38, %v1006_v19 }
 0x18f   : > { %v1500_v27 = vsel %vm3450_vm4, %v1178_v40, %v1476_v31  ;;  %1013 = vrot.lane.b32.xlu1 %v3550_v5, %s1889_s6  ;;  %v1179_v60 = vsel %vm3451_vm3, %v1170_v3, %v1031_v10  ;;  %v1415_v5 = vsel %vm1060_vm5, %v1407_v6, %v2700_v52  ;;  %v3564_v52 = vld [vmem:[#allocation54_spill] sm:$0xff]  ;;  %vm3149_vm3 = vmpackc.low %vm1508_vm11, %vm1508_vm11  ;;  %v3576_v3 = vld [vmem:[#allocation44_spill] sm:$0xff] }
 0x190   : > { %1509 = vst.msk [vmem:[#allocation3] sm:$0xff] %vm1508_vm11, %v1500_v27  ;;  %778 = vrot.lane.b32.xlu0 %v3560_v36, %s1882_s26  ;;  %v1423_v15 = vsel %vm1069_vm6, %v1415_v5, %v2708_v48  ;;  %v1416_v48 = vsel %vm1060_vm5, %v1408_v43, %v3564_v52  ;;  %v3575_v27 = vld [vmem:[#allocation42_spill] sm:$0xff] }
 0x191   : > { %v1478_v44 = vpop.permute.xlu1 %1477  ;;  %v1431_v49 = vsel %vm3452_vm7, %v1423_v15, %v2716_v26  ;;  %v3565_v26 = vld [vmem:[#allocation55_spill] sm:$0xff]  ;;  %v3579_v15 = vld [vmem:[#allocation48_spill] sm:$0xff] }
 0x192   : > { %v485_v17 = vpop.permute.xlu0 %484  ;;  %v1501_v63 = vsel %vm3450_vm4, %v1179_v60, %v1478_v44  ;;  %v1424_v18 = vsel %vm1069_vm6, %v1416_v48, %v3565_v26  ;;  %vm3567_vm4 = vcmask 261120   ;;  %v3577_v44 = vld [vmem:[#allocation45_spill] sm:$0xff]  ;;  %v3583_v48 = vld [vmem:[#allocation62_spill] sm:$0xff] }
 0x193   : > { %1510 = vst.msk [vmem:[#allocation3 + $0x8] sm:$0xff] %vm1508_vm11, %v1501_v63  ;;  %780 = vrot.lane.b32.xlu1 %v3561_v20, %s1882_s26 }
 0x194   : > { %1036 = vrot.lane.b32.xlu0 %v3532_v16, %s1890_s7  ;;  %v1439_v16 = vsel %vm1087_vm8, %v1431_v49, %v2724_v25  ;;  %v1056_v25 = vsel %vm227_vm0, %v1847_v61, %v485_v17 }
 0x195   : > { %v487_v19 = vpop.permute.xlu1 %486  ;;  %v1447_v11 = vsel %vm3454_vm9, %v1439_v16, %v2732_v58  ;;  %v3581_v16 = vld [vmem:[#allocation50_spill] sm:$0xff] }
 0x196   : > { %v3118_v22 = vpop.permute.xlu0 %874  ;;  %v1455_v47 = vsel %vm3453_vm10, %v1447_v11, %v2743_v1  ;;  %v1057_v53 = vsel %vm227_vm0, %v1848_v62, %v487_v19  ;;  %v3580_v19 = vld [vmem:[#allocation58_spill] sm:$0xff] }
 0x197   : > { %1038 = vrot.lane.b32.xlu1 %v3555_v14, %s1890_s7  ;;  %v1432_v14 = vsel %vm3452_vm7, %v1424_v18, %v3566_v8  ;;  %v1463_v21 = vsel %vm3567_vm4, %v1455_v47, %v2755_v23  ;;  %v1518_v28 = vld [vmem:[#allocation3] sm:$0xff]  ;;  %v3571_v23 = vld [vmem:[#allocation57_spill] sm:$0xff]  ;;  %v1409_v49 = vsel %vm227_vm0, %v3559_v34, %v3580_v19  ;;  %v3587_v8 = vld [vmem:[#allocation66_spill] sm:$0xff] }
 0x198   : > { %834 = vrot.lane.b32.xlu0 %v3563_v12, %s1883_s27  ;;  %v1440_v0 = vsel %vm1087_vm8, %v1432_v14, %v2730_v37  ;;  %v3582_v12 = vld [vmem:[#allocation60_spill] sm:$0xff] }
 0x199   : > { %v3140_v56 = vpop.permute.xlu1 %876  ;;  %v1448_v57 = vsel %vm3454_vm9, %v1440_v0, %v3571_v23  ;;  %v1417_v52 = vsel %vm1060_vm5, %v1409_v49, %v3582_v12  ;;  %v3584_v47 = vld [vmem:[#allocation64_spill] sm:$0xff]  ;;  %v3592_v23 = vld [vmem:[#allocation10_spill] sm:$0xff]  ;;  %v1117_v12 = vsel %vm3567_vm4, %v3029_v54, %v3071_v51 }
 0x19a   : > { %v550_v41 = vpop.permute.xlu0 %549  ;;  %v1519_v2 = vld [vmem:[#allocation3 + $0x8] sm:$0xff]  ;;  %v1456_v10 = vsel %vm3453_vm10, %v1448_v57, %v2753_v24  ;;  %v1425_v11 = vsel %vm1069_vm6, %v1417_v52, %v3583_v48  ;;  %v1526_v49 = vld [vmem:[%s3379_s2] sm:$0xf]  ;;  %v1126_v48 = vsel %vm1123_vm12, %v1117_v12, %v3118_v22 }
 0x19b   : > { %v1065_v58 = vsel %vm1060_vm5, %v1056_v25, %v550_v41  ;;  %836 = vrot.lane.b32.xlu1 %v3570_v33, %s1883_s27  ;;  %v1785_v29 = vpack.c.bf16 %v1519_v2, %v1518_v28  ;;  %v1464_v42 = vsel %vm3567_vm4, %v1456_v10, %v2776_v32  ;;  %v1433_v34 = vsel %vm3452_vm7, %v1425_v11, %v3584_v47  ;;  %v3585_v25 = vld [vmem:[#allocation59_spill] sm:$0xff]  ;;  %v3586_v41 = vld [vmem:[#allocation40_spill] sm:$0xff] }
 0x19c   : > { %1483 = vrot.lane.b32.xlu0 %v1463_v21, %s1891_s8  ;;  %v1441_v14 = vsel %vm1087_vm8, %v1433_v34, %v3587_v8  ;;  %v3588_v21 = vld [vmem:[#allocation52_spill] sm:$0xff]  ;;  %v3591_v33 = vld [vmem:[#allocation63_spill] sm:$0xff] }
 0x19d   : > { %1787 = vmatpush3.bf16.xpose.msk.msra.mxu0 %vm3149_vm3, %v1785_v29  ;;  %v552_v37 = vpop.permute.xlu1 %551  ;;  %v3590_v2 = vld [vmem:[#allocation68_spill] sm:$0xff] }
 0x19e   : > { %v3163_v13 = vpop.permute.xlu0 %899  ;;  %v1066_v45 = vsel %vm1060_vm5, %v1057_v53, %v552_v37  ;;  %1788 = vmatprep.subr.bf16.mxu0 %v3572_v55  ;;  %v1449_v0 = vsel %vm3454_vm9, %v1441_v14, %v3590_v2  ;;  %v3593_v53 = vld [vmem:[#allocation65_spill] sm:$0xff]  ;;  %v3594_v37 = vld [vmem:[#allocation14_spill] sm:$0xff] }
 0x19f   : > { %1485 = vrot.lane.b32.xlu1 %v1464_v42, %s1891_s8  ;;  %v1457_v57 = vsel %vm3453_vm10, %v1449_v0, %v3592_v23  ;;  %v1135_v11 = vsel %vm1132_vm13, %v1126_v48, %v3163_v13 }
 0x1a0   : > { %882 = vrot.lane.b32.xlu0 %v3573_v35, %s1884_s28  ;;  %v1465_v42 = vsel %vm3567_vm4, %v1457_v57, %v3594_v37  ;;  %v3595_v35 = vld [vmem:[#allocation67_spill] sm:$0xff] }
 0x1a1   : > { %v3174_v40 = vpop.permute.xlu1 %901 }
 0x1a2   : > { %v606_v24 = vpop.permute.xlu0 %605 }
 0x1a3   : > { %v1074_v31 = vsel %vm1069_vm6, %v1065_v58, %v606_v24  ;;  %884 = vrot.lane.b32.xlu1 %v3575_v27, %s1884_s28  ;;  %v3589_v58 = vld [vmem:[#allocation61_spill] sm:$0xff] }
 0x1a4   : > { %907 = vrot.lane.b32.xlu0 %v3574_v4, %s1885_s29  ;;  %v3597_v4 = vld [vmem:[#allocation12_spill] sm:$0xff] }
 0x1a5   : > { %v608_v38 = vpop.permute.xlu1 %607 }
 0x1a6   : > { %v3181_v32 = vpop.permute.xlu0 %924  ;;  %v1075_v36 = vsel %vm1069_vm6, %v1066_v45, %v608_v38  ;;  %v3598_v38 = vld [vmem:[#allocation4_spill] sm:$0xff] }
 0x1a7   : > { %909 = vrot.lane.b32.xlu1 %v3576_v3, %s1885_s29 }
 0x1a8   : > { %932 = vrot.lane.b32.xlu0 %v3541_v50, %s1886_s30  ;;  %v3578_v50 = vld [vmem:[#allocation34_spill] sm:$0xff] }
 0x1a9   : > { %v3188_v60 = vpop.permute.xlu1 %926 }
 0x1aa   : > { %v655_v6 = vpop.permute.xlu0 %654 }
 0x1ab   : > { %v1083_v17 = vsel %vm3452_vm7, %v1074_v31, %v655_v6  ;;  %934 = vrot.lane.b32.xlu1 %v3577_v44, %s1886_s30  ;;  %v3596_v31 = vld [vmem:[#allocation36_spill] sm:$0xff] }
 0x1ac   : > { %960 = vrot.lane.b32.xlu0 %v3545_v7, %s1887_s4 }
 0x1ad   : > { %v657_v20 = vpop.permute.xlu1 %656 }
 0x1ae   : > { %v953_v63 = vpop.permute.xlu0 %952  ;;  %v1084_v5 = vsel %vm3452_vm7, %v1075_v36, %v657_v20 }
 0x1af   : > { %962 = vrot.lane.b32.xlu1 %v3579_v15, %s1887_s4 }
 0x1b0   : > { %988 = vrot.lane.b32.xlu0 %v3578_v50, %s1888_s5 }
 0x1b1   : > { %v955_v43 = vpop.permute.xlu1 %954 }
 0x1b2   : > { %v687_v46 = vpop.permute.xlu0 %686 }
 0x1b3   : > { %v1092_v7 = vsel %vm1087_vm8, %v1083_v17, %v687_v46  ;;  %990 = vrot.lane.b32.xlu1 %v3581_v16, %s1888_s5  ;;  %v3599_v17 = vld [vmem:[#allocation15_spill] sm:$0xff]  ;;  %v1894_v16 = vmov 0  }
 0x1b4   : > { %1015 = vrot.lane.b32.xlu0 %v3552_v39, %s1889_s6  ;;  %v1410_v39 = vsel %vm227_vm0, %v3586_v41, %v3585_v25 }
 0x1b5   : > { %v689_v18 = vpop.permute.xlu1 %688  ;;  %v1418_v28 = vsel %vm1060_vm5, %v1410_v39, %v3589_v58  ;;  %1844 = vset.pattern.permute.xlu0 %v1894_v16 }
 0x1b6   : > { %v981_v26 = vpop.permute.xlu0 %980  ;;  %v1093_v61 = vsel %vm1087_vm8, %v1084_v5, %v689_v18  ;;  %v1426_v29 = vsel %vm1069_vm6, %v1418_v28, %v3591_v33  ;;  %v3600_v5 = vmov 0.0   ;;  %v1144_v18 = vsel %vm1141_vm14, %v1135_v11, %v3181_v32  ;;  %v1849_v28 = vld [vmem:[#allocation2 + $0xc0] sm:$0xff] }
 0x1b7   : > { %1017 = vrot.lane.b32.xlu1 %v3588_v21, %s1889_s6  ;;  %v1153_v54 = vsel %vm1150_vm15, %v1144_v18, %v953_v63 }
 0x1b8   : > { %1040 = vrot.lane.b32.xlu0 %v3557_v30, %s1890_s7  ;;  %v1434_v30 = vsel %vm3452_vm7, %v1426_v29, %v3593_v53  ;;  %vm1893_vm7 = vmmov 0   ;;  %v1162_v25 = vsel %vm1159_vm1, %v1153_v54, %v981_v26 }
 0x1b9   : > { %v983_v62 = vpop.permute.xlu1 %982  ;;  %v1442_v24 = vsel %vm1087_vm8, %v1434_v30, %v3595_v35  ;;  %1781 = vmatprep.mubr.msk.f32.mxu0 %vm1893_vm7, %v3600_v5  ;;  %vm3601_vm7 = vmmov %vm3567_vm4 }
 0x1ba   : > { %v719_v10 = vpop.permute.xlu0 %718  ;;  %v1450_v27 = vsel %vm3454_vm9, %v1442_v24, %v3597_v4 }
 0x1bb   : > { %v1101_v45 = vsel %vm3454_vm9, %v1092_v7, %v719_v10  ;;  %1042 = vrot.lane.b32.xlu1 %v3596_v31, %s1890_s7  ;;  %v1458_v36 = vsel %vm3453_vm10, %v1450_v27, %v3598_v38  ;;  %v1850_v10 = vld [vmem:[#allocation2 + $0xe0] sm:$0xff] }
 0x1bc   : > { %1487 = vrot.lane.b32.xlu0 %v1465_v42, %s1891_s8  ;;  %v1466_v44 = vsel %vm3567_vm4, %v1458_v36, %v3599_v17  ;;  %vm3602_vm4 = vcmask 490496  }
 0x1bd   : > { %v721_v6 = vpop.permute.xlu1 %720 }
 0x1be   : > { %v1008_v3 = vpop.permute.xlu0 %1007  ;;  %v1102_v20 = vsel %vm3454_vm9, %v1093_v61, %v721_v6  ;;  %v1118_v61 = vsel %vm3601_vm7, %v3053_v9, %v3091_v59  ;;  %vm3603_vm7 = vcmask 523264  }
 0x1bf   : > { %1489 = vrot.lane.b32.xlu1 %v1466_v44, %s1891_s8  ;;  %v1127_v51 = vsel %vm1123_vm12, %v1118_v61, %v3140_v56  ;;  %v1171_v13 = vsel %vm1168_vm2, %v1162_v25, %v1008_v3  ;;  %vm3605_vm9 = vmmov %vm3603_vm7 }
 0x1c0   : > { %1529 = vperm.xlu0 %1844, %v1526_v49   ;;  %v1136_v22 = vsel %vm1132_vm13, %v1127_v51, %v3174_v40 }
 0x1c1   : > { %v1010_v15 = vpop.permute.xlu1 %1009  ;;  %v1145_v32 = vsel %vm1141_vm14, %v1136_v22, %v3188_v60 }
 0x1c2   : > { %v775_v50 = vpop.permute.xlu0 %774  ;;  %v1154_v9 = vsel %vm1150_vm15, %v1145_v32, %v955_v43 }
 0x1c3   : > { %v3252_v19 = vsel %vm3453_vm10, %v1101_v45, %v775_v50  ;;  %v1163_v56 = vsel %vm1159_vm1, %v1154_v9, %v983_v62 }
 0x1c4   : > { %v1172_v63 = vsel %vm1168_vm2, %v1163_v56, %v1010_v15 }
 0x1c5   : > { %v777_v7 = vpop.permute.xlu1 %776 }
 0x1c6   : > { %v1033_v46 = vpop.permute.xlu0 %1032  ;;  %v3261_v52 = vsel %vm3453_vm10, %v1102_v20, %v777_v7  ;;  %vm3604_vm10 = vmmov %vm3602_vm4 }
 0x1c7   : > { %v1180_v41 = vsel %vm3602_vm4, %v1171_v13, %v1033_v46 }
 0x1c9   : > { %v1035_v34 = vpop.permute.xlu1 %1034 }
 0x1ca   : > { %v831_v47 = vpop.permute.xlu0 %830  ;;  %v1181_v40 = vsel %vm3604_vm10, %v1172_v63, %v1035_v34  ;;  %vm3609_vm10 = vmmov %vm3603_vm7 }
 0x1cd   : > { %v833_v8 = vpop.permute.xlu1 %832 }
 0x1ce   : > { %v1480_v39 = vpop.permute.xlu0 %1479 }
 0x1cf   : > { %v1502_v59 = vsel %vm3603_vm7, %v1180_v41, %v1480_v39 }
 0x1d0   : > { %1511 = vst.msk [vmem:[#allocation3 + $0x10] sm:$0xff] %vm1508_vm11, %v1502_v59 }
 0x1d1   : > { %v1482_v14 = vpop.permute.xlu1 %1481 }
 0x1d2   : > { %v489_v26 = vpop.permute.xlu0 %488  ;;  %v1503_v60 = vsel %vm3605_vm9, %v1181_v40, %v1482_v14  ;;  %vm3608_vm9 = vmmov %vm3602_vm4 }
 0x1d3   : > { %1512 = vst.msk [vmem:[#allocation3 + $0x18] sm:$0xff] %vm1508_vm11, %v1503_v60  ;;  %v1058_v43 = vsel %vm227_vm0, %v1849_v28, %v489_v26 }
 0x1d5   : > { %v491_v58 = vpop.permute.xlu1 %490 }
 0x1d6   : > { %v879_v21 = vpop.permute.xlu0 %878  ;;  %v1059_v62 = vsel %vm227_vm0, %v1850_v10, %v491_v58  ;;  %vm3606_vm0 = vcmask 261120  }
 0x1d7   : > { %v1520_v29 = vld [vmem:[#allocation3 + $0x10] sm:$0xff]  ;;  %v1119_v16 = vsel %vm3606_vm0, %v3252_v19, %v831_v47 }
 0x1d8   : > { %v1128_v12 = vsel %vm1123_vm12, %v1119_v16, %v879_v21 }
 0x1d9   : > { %v881_v0 = vpop.permute.xlu1 %880 }
 0x1da   : > { %v554_v2 = vpop.permute.xlu0 %553  ;;  %v1521_v23 = vld [vmem:[#allocation3 + $0x18] sm:$0xff] }
 0x1db   : > { %v3292_v33 = vsel %vm1060_vm5, %v1058_v43, %v554_v2  ;;  %v1789_v57 = vpack.c.bf16 %v1521_v23, %v1520_v29 }
 0x1dd   : > { %1791 = vmatpush3.bf16.xpose.msk.msra.mxu0 %vm3149_vm3, %v1789_v57  ;;  %v556_v30 = vpop.permute.xlu1 %555 }
 0x1de   : > { %v904_v53 = vpop.permute.xlu0 %903  ;;  %v3298_v37 = vsel %vm1060_vm5, %v1059_v62, %v556_v30  ;;  %1792 = vmatprep.subr.bf16.mxu0 %v3572_v55  ;;  %vm3607_vm5 = vmmov %vm3606_vm0  ;;  %vm3610_vm0 = vcmask 130048  }
 0x1df   : > { %v1137_v48 = vsel %vm1132_vm13, %v1128_v12, %v904_v53  ;;  %v1120_v61 = vsel %vm3607_vm5, %v3261_v52, %v833_v8  ;;  %vm3611_vm5 = vcmask 195584  }
 0x1e0   : > { %v1129_v51 = vsel %vm1123_vm12, %v1120_v61, %v881_v0 }
 0x1e1   : > { %v906_v45 = vpop.permute.xlu1 %905 }
 0x1e2   : > { %v610_v42 = vpop.permute.xlu0 %609  ;;  %v1138_v22 = vsel %vm1132_vm13, %v1129_v51, %v906_v45 }
 0x1e3   : > { %v1076_v29 = vsel %vm1069_vm6, %v3292_v33, %v610_v42 }
 0x1e5   : > { %v612_v24 = vpop.permute.xlu1 %611 }
 0x1e6   : > { %v929_v35 = vpop.permute.xlu0 %928  ;;  %v1077_v30 = vsel %vm1069_vm6, %v3298_v37, %v612_v24 }
 0x1e7   : > { %v1146_v11 = vsel %vm1141_vm14, %v1137_v48, %v929_v35 }
 0x1e9   : > { %v931_v4 = vpop.permute.xlu1 %930 }
 0x1ea   : > { %v659_v31 = vpop.permute.xlu0 %658  ;;  %v1147_v47 = vsel %vm1141_vm14, %v1138_v22, %v931_v4  ;;  %v1517_v22 = vld [vmem:[%s3378_s1] sm:$0xf] }
 0x1eb   : > { %v1085_v10 = vsel %vm3610_vm0, %v1076_v29, %v659_v31 }
 0x1ed   : > { %v661_v38 = vpop.permute.xlu1 %660 }
 0x1ee   : > { %v957_v27 = vpop.permute.xlu0 %956 }
 0x1ef   : > { %v1155_v54 = vsel %vm1150_vm15, %v1146_v11, %v957_v27 }
 0x1f1   : > { %v959_v3 = vpop.permute.xlu1 %958 }
 0x1f2   : > { %v691_v36 = vpop.permute.xlu0 %690  ;;  %v1156_v39 = vsel %vm1150_vm15, %v1147_v47, %v959_v3 }
 0x1f3   : > { %v1094_v62 = vsel %vm1087_vm8, %v1085_v10, %v691_v36 }
 0x1f5   : > { %v693_v17 = vpop.permute.xlu1 %692 }
 0x1f6   : > { %v985_v6 = vpop.permute.xlu0 %984 }
 0x1f7   : > { %v1164_v25 = vsel %vm1159_vm1, %v1155_v54, %v985_v6 }
 0x1f9   : > { %v987_v20 = vpop.permute.xlu1 %986 }
 0x1fa   : > { %v723_v44 = vpop.permute.xlu0 %722  ;;  %v1165_v8 = vsel %vm1159_vm1, %v1156_v39, %v987_v20 }
 0x1fb   : > { %v1103_v53 = vsel %vm3611_vm5, %v1094_v62, %v723_v44 }
 0x1fd   : > { %v725_v50 = vpop.permute.xlu1 %724 }
 0x1fe   : > { %v1012_v5 = vpop.permute.xlu0 %1011 }
 0x1ff   : > { %v1173_v19 = vsel %vm1168_vm2, %v1164_v25, %v1012_v5 }
 0x201   : > { %v1014_v49 = vpop.permute.xlu1 %1013 }
 0x202   : > { %v779_v15 = vpop.permute.xlu0 %778  ;;  %v1174_v9 = vsel %vm1168_vm2, %v1165_v8, %v1014_v49 }
 0x205   : > { %v781_v7 = vpop.permute.xlu1 %780 }
 0x206   : > { %v1037_v46 = vpop.permute.xlu0 %1036 }
 0x207   : > { %v1182_v13 = vsel %vm3608_vm9, %v1173_v19, %v1037_v46  ;;  %vm3612_vm9 = vcmask 228352  }
 0x208   : > { %v1112_v45 = vsel %vm3612_vm9, %v1103_v53, %v779_v15 }
 0x209   : > { %v1039_v34 = vpop.permute.xlu1 %1038 }
 0x20a   : > { %v835_v18 = vpop.permute.xlu0 %834  ;;  %v1183_v59 = vsel %vm3602_vm4, %v1174_v9, %v1039_v34  ;;  %vm3614_vm4 = vcmask 261120  }
 0x20b   : > { %v1121_v27 = vsel %vm3614_vm4, %v1112_v45, %v835_v18  ;;  %vm3617_vm6 = vmmov %vm3614_vm4 }
 0x20d   : > { %v837_v41 = vpop.permute.xlu1 %836 }
 0x20e   : > { %v1484_v32 = vpop.permute.xlu0 %1483 }
 0x20f   : > { %v1504_v52 = vsel %vm3609_vm10, %v1182_v13, %v1484_v32  ;;  %vm3613_vm10 = vmmov %vm3610_vm0 }
 0x210   : > { %1513 = vst.msk [vmem:[#allocation3 + $0x20] sm:$0xff] %vm1508_vm11, %v1504_v52  ;;  %vm3616_vm0 = vmmov %vm3612_vm9 }
 0x211   : > { %v1486_v63 = vpop.permute.xlu1 %1485 }
 0x212   : > { %v883_v56 = vpop.permute.xlu0 %882  ;;  %v1505_v40 = vsel %vm3603_vm7, %v1183_v59, %v1486_v63  ;;  %vm3615_vm7 = vmmov %vm3611_vm5  ;;  %vm3619_vm5 = vcmask 523264  }
 0x213   : > { %1514 = vst.msk [vmem:[#allocation3 + $0x28] sm:$0xff] %vm1508_vm11, %v1505_v40  ;;  %v1130_v42 = vsel %vm1123_vm12, %v1121_v27, %v883_v56 }
 0x215   : > { %v885_v14 = vpop.permute.xlu1 %884 }
 0x216   : > { %v908_v26 = vpop.permute.xlu0 %907 }
 0x217   : > { %v1522_v58 = vld [vmem:[#allocation3 + $0x20] sm:$0xff]  ;;  %v1139_v36 = vsel %vm1132_vm13, %v1130_v42, %v908_v26 }
 0x219   : > { %v910_v21 = vpop.permute.xlu1 %909 }
 0x21a   : > { %v933_v60 = vpop.permute.xlu0 %932  ;;  %v1523_v28 = vld [vmem:[#allocation3 + $0x28] sm:$0xff] }
 0x21b   : > { %v1793_v43 = vpack.c.bf16 %v1523_v28, %v1522_v58  ;;  %v1148_v37 = vsel %vm1141_vm14, %v1139_v36, %v933_v60 }
 0x21d   : > { %1795 = vmatpush3.bf16.xpose.msk.msra.mxu0 %vm3149_vm3, %v1793_v43  ;;  %v935_v0 = vpop.permute.xlu1 %934 }
 0x21e   : > { %v961_v2 = vpop.permute.xlu0 %960  ;;  %1796 = vmatprep.subr.bf16.mxu0 %v3572_v55  ;;  %v1086_v55 = vsel %vm3613_vm10, %v1077_v30, %v661_v38 }
 0x21f   : > { %v1095_v33 = vsel %vm1087_vm8, %v1086_v55, %v693_v17  ;;  %v1157_v38 = vsel %vm1150_vm15, %v1148_v37, %v961_v2  ;;  %vm3618_vm8 = vcmask 490496  }
 0x220   : > { %v1104_v31 = vsel %vm3615_vm7, %v1095_v33, %v725_v50 }
 0x221   : > { %v963_v57 = vpop.permute.xlu1 %962  ;;  %v1113_v3 = vsel %vm3616_vm0, %v1104_v31, %v781_v7 }
 0x222   : > { %v989_v23 = vpop.permute.xlu0 %988  ;;  %v1122_v44 = vsel %vm3617_vm6, %v1113_v3, %v837_v41 }
 0x223   : > { %v1131_v20 = vsel %vm1123_vm12, %v1122_v44, %v885_v14  ;;  %v1166_v17 = vsel %vm1159_vm1, %v1157_v38, %v989_v23  ;;  %vm3620_vm12 = vmmov %vm3618_vm8 }
 0x224   : > { %v1140_v5 = vsel %vm1132_vm13, %v1131_v20, %v910_v21  ;;  %vm3621_vm13 = vmmov %vm3619_vm5 }
 0x225   : > { %v991_v4 = vpop.permute.xlu1 %990  ;;  %v1149_v15 = vsel %vm1141_vm14, %v1140_v5, %v935_v0  ;;  %vm1630_vm14 = vcmask 519168  }
 0x226   : > { %v1016_v35 = vpop.permute.xlu0 %1015  ;;  %v1158_v16 = vsel %vm1150_vm15, %v1149_v15, %v963_v57 }
 0x227   : > { %v1175_v50 = vsel %vm1168_vm2, %v1166_v17, %v1016_v35  ;;  %v1167_v48 = vsel %vm1159_vm1, %v1158_v16, %v991_v4 }
 0x229   : > { %v1018_v6 = vpop.permute.xlu1 %1017 }
 0x22a   : > { %v1041_v24 = vpop.permute.xlu0 %1040  ;;  %v1176_v11 = vsel %vm1168_vm2, %v1167_v48, %v1018_v6 }
 0x22b   : > { %v1184_v49 = vsel %vm3618_vm8, %v1175_v50, %v1041_v24 }
 0x22d   : > { %v1043_v7 = vpop.permute.xlu1 %1042 }
 0x22e   : > { %v1488_v46 = vpop.permute.xlu0 %1487  ;;  %v1185_v18 = vsel %vm3620_vm12, %v1176_v11, %v1043_v7 }
 0x22f   : > { %v1506_v12 = vsel %vm3619_vm5, %v1184_v49, %v1488_v46 }
 0x230   : > { %1515 = vst.msk [vmem:[#allocation3 + $0x30] sm:$0xff] %vm1508_vm11, %v1506_v12 }
 0x231   : > { %v1490_v34 = vpop.permute.xlu1 %1489 }
 0x232   : > { %v1507_v61 = vsel %vm3621_vm13, %v1185_v18, %v1490_v34 }
 0x233   : > { %1516 = vst.msk [vmem:[#allocation3 + $0x38] sm:$0xff] %vm1508_vm11, %v1507_v61 }
 0x237   : > { %v1524_v54 = vld [vmem:[#allocation3 + $0x30] sm:$0xff] }
 0x23a   : > { %v1525_v51 = vld [vmem:[#allocation3 + $0x38] sm:$0xff] }
 0x23b   : > { %v1797_v25 = vpack.c.bf16 %v1525_v51, %v1524_v54 }
 0x23d   : > { %1799 = vmatpush3.bf16.xpose.msk.msra.mxu0 %vm3149_vm3, %v1797_v25 }
 0x23f   : > { %v1530_v19 = vpop.permute.xlu0 %1529 }
 0x244   : > { %1782 = vmatmul.mubr.msk.f32.vlgmr.msra.gmra.mrb[0].mxu0 %vm1508_vm11, %v1517_v22 }
 0x317   : > { %v1626_v47 = vpop.f32.mrb[0].mxu0 }
 0x318   : > { %v1627_v13 = vadd.f32 %v1626_v47, %v1530_v19  ;;  %v1783_v32 = vpop.f32.mrb[1].mxu0 }
 0x31a   : > { %1631 = vst.msk [vmem:[%s222_s20] sm:$0xf] %vm1630_vm14, %v1627_v13 }
 0x31b PF: > { %s13_s14 = sadd.s32 1, %s1873_s14   ;;  %s3622_s12 = smov %s1869_s13 }
 0x31c   : > { %p10_p5 = scmp.ge.s32.totalorder %s13_s14, 4   ;;  %s3623_s13 = smov %s3625_s15 }
 0x31e   :  { %12 = sbr.rel (!%p10_p5) target bundleno = 2 (0x2), region = 74 }

</bundles_post_ra>
